<compile_context>
chip_gen: v5e
topology: v5e:2x2
jax: 0.10.0
libtpu: 0.0.40
codegen_flags: <defaults>
</compile_context>

<pallas_src>
import functools

import numpy as np
import jax
import jax.numpy as jnp
from jax.experimental import pallas as pl
from jax.experimental.pallas import tpu as pltpu


# ----------------------------------------------------------------------------
# tiling helpers
# ----------------------------------------------------------------------------
def _pick_hw_tile(hw, channels, budget_bytes=2 << 20):
    """Largest multiple of 128 dividing hw, with C*tile*4 <= budget; else full hw."""
    if hw % 128 != 0:
        return hw                      # full dim (satisfies the (8,128) rule)
    cap = max(128, ((budget_bytes // (channels * 4)) // 128) * 128)
    best = 128
    t = 128
    limit = min(hw, cap)
    while t <= limit:
        if hw % t == 0:
            best = t
        t += 128
    return best


def _pick_row_tile(r, cap=256):
    """Largest multiple of 8 that divides r (capped); else the full extent."""
    if r % 8 != 0:
        return r
    best = 8
    t = 8
    limit = min(r, cap)
    while t <= limit:
        if r % t == 0:
            best = t
        t += 8
    return best


# ----------------------------------------------------------------------------
# Pallas kernel 1 (fast path): the WHOLE sampling loop fused into one call.
# ----------------------------------------------------------------------------
def _fused_sample_kernel(w_ref, coefs_ref, x_ref, out_ref, *, channels, num_steps):
    # w_ref:     SMEM f32[S*C*C], row-major per step, already scaled by cos(t_s)
    # coefs_ref: SMEM f32[S*5]  = per step [1/alpha_t, sigma_t, alpha_prev, sigma_prev, cond]
    # x_ref/out_ref: VMEM blocks of shape (1, C, TILE_HW)
    x = x_ref[0]                                          # (C, TILE_HW)
    # keep the evolving latent as a list of lane-dense rows (avoids per-step
    # concatenates / sublane reslices)
    xs = [x[ci:ci + 1, :] for ci in range(channels)]      # C x (1, TILE_HW)

    for s in range(num_steps):                            # static unroll (small S)
        base_w = s * channels * channels
        base_c = s * 5
        inv_a_t = coefs_ref[base_c + 0]
        sigma_t = coefs_ref[base_c + 1]
        alpha_p = coefs_ref[base_c + 2]
        sigma_p = coefs_ref[base_c + 3]
        cond = coefs_ref[base_c + 4]

        # eps = (cos(t) * W) @ x  + cond     -- small-C channel mix on the VPU
        eps = []
        for ci in range(channels):
            acc = w_ref[base_w + ci * channels + 0] * xs[0]
            for cj in range(1, channels):
                acc = acc + w_ref[base_w + ci * channels + cj] * xs[cj]
            eps.append(acc + cond)

        # DDIM update
        new_xs = []
        for ci in range(channels):
            x0 = jnp.clip((xs[ci] - sigma_t * eps[ci]) * inv_a_t, -1.0, 1.0)
            new_xs.append(alpha_p * x0 + sigma_p * eps[ci])
        xs = new_xs

    out_ref[0] = jnp.concatenate(xs, axis=0)              # single store per tile


def fused_sample(x_nchw, w_all_flat, coefs_all_flat, num_steps):
    """Run the full fused sampling loop in one pallas_call.

    x_nchw:         (N, C, H, W) f32
    w_all_flat:     (S*C*C,) f32  -- per-step channel-mix weights * cos(t_s)
    coefs_all_flat: (S*5,)  f32  -- per-step [1/alpha_t, sigma_t, alpha_prev, sigma_prev, cond]
    """
    n, c, h, w = x_nchw.shape
    hw = h * w
    tile_hw = _pick_hw_tile(hw, c)
    xf = x_nchw.reshape(n, c, hw)
    kernel = functools.partial(_fused_sample_kernel, channels=c, num_steps=num_steps)
    out = pl.pallas_call(
        kernel,
        out_shape=jax.ShapeDtypeStruct((n, c, hw), jnp.float32),
        grid=(n, hw // tile_hw),
        in_specs=[
            pl.BlockSpec(memory_space=pltpu.MemorySpace.SMEM),      # all-step weights
            pl.BlockSpec(memory_space=pltpu.MemorySpace.SMEM),      # all-step coefs
            pl.BlockSpec((1, c, tile_hw), lambda b, t: (b, 0, t)),  # x block
        ],
        out_specs=pl.BlockSpec((1, c, tile_hw), lambda b, t: (b, 0, t)),
        compiler_params=pltpu.CompilerParams(
            dimension_semantics=("parallel", "parallel")),
    )(w_all_flat, coefs_all_flat, xf)
    return out.reshape(n, c, h, w)


# ----------------------------------------------------------------------------
# Pallas kernel 2 (fallback): tiled elementwise DDIM update for black-box models
# ----------------------------------------------------------------------------
def _ddim_update_kernel(coefs_ref, x_ref, eps_ref, out_ref):
    # coefs_ref: SMEM f32[4] = [1/alpha_t, sigma_t, alpha_prev, sigma_prev]
    inv_a_t = coefs_ref[0]
    sigma_t = coefs_ref[1]
    alpha_p = coefs_ref[2]
    sigma_p = coefs_ref[3]
    x = x_ref[...]
    eps = eps_ref[...]
    x0 = jnp.clip((x - sigma_t * eps) * inv_a_t, -1.0, 1.0)
    out_ref[...] = alpha_p * x0 + sigma_p * eps


def ddim_update(x_nchw, eps_nchw, coefs4):
    n, c, h, w = x_nchw.shape
    hw = h * w
    r = n * c
    tile_r = _pick_row_tile(r)
    tile_c = _pick_hw_tile(hw, tile_r)
    x2 = x_nchw.reshape(r, hw)
    e2 = eps_nchw.reshape(r, hw)
    out = pl.pallas_call(
        _ddim_update_kernel,
        out_shape=jax.ShapeDtypeStruct((r, hw), jnp.float32),
        grid=(r // tile_r, hw // tile_c),
        in_specs=[
            pl.BlockSpec(memory_space=pltpu.MemorySpace.SMEM),
            pl.BlockSpec((tile_r, tile_c), lambda i, j: (i, j)),
            pl.BlockSpec((tile_r, tile_c), lambda i, j: (i, j)),
        ],
        out_specs=pl.BlockSpec((tile_r, tile_c), lambda i, j: (i, j)),
        compiler_params=pltpu.CompilerParams(
            dimension_semantics=("parallel", "parallel")),
    )(coefs4, x2, e2)
    return out.reshape(n, c, h, w)


# ----------------------------------------------------------------------------
# Toy deterministic denoiser "model" handed to the sampler (external to Sampler)
# ----------------------------------------------------------------------------
class ToyDenoiser:
    def __init__(self, channels):
        k = np.arange(channels * channels, dtype=np.float32).reshape(channels, channels)
        self.w = jnp.asarray(0.05 * np.sin(k), dtype=jnp.float32)

    def __call__(self, x_nchw, t, **kwargs):
        # Reference / fallback eps prediction (pure jnp).  The Sampler's fast
        # path folds this 1x1-conv + cos(t) scale into the fused Pallas kernel.
        cond = kwargs.get("cond", 0.0)
        eps = jnp.einsum('ij,njhw->nihw', self.w, x_nchw)
        return eps * jnp.cos(jnp.float32(t)) + cond


# ----------------------------------------------------------------------------
# Sampler (Pallas port)
# ----------------------------------------------------------------------------
class Sampler:
    """Port of NeMo imagen Sampler: forward(model, model_kwargs, shape, z=None)."""

    def __init__(self, num_steps=4):
        # TODO(synk): reference Sampler.forward is an abstract `pass`; we implement
        # the shared deterministic DDIM denoising loop of the concrete NeMo
        # samplers, with the whole loop fused into a single Pallas call.
        self.num_steps = num_steps

    def _schedule(self):
        ts = np.linspace(0.9, 0.0, self.num_steps + 1, dtype=np.float32)
        alphas = np.cos(ts * np.pi / 2.0).astype(np.float32)
        sigmas = np.sin(ts * np.pi / 2.0).astype(np.float32)
        return ts, alphas, sigmas

    def __call__(self, model, model_kwargs, shape, z=None, key=None):
        n, c, h, w = shape
        if z is None:
            if key is None:
                key = jax.random.PRNGKey(0)
            z = jax.random.normal(key, shape, dtype=jnp.float32)
        x = z.astype(jnp.float32)

        ts, alphas, sigmas = self._schedule()
        cond_val = model_kwargs.get("cond", 0.0)
        num_steps = self.num_steps

        # ---- fast path: model exposes its channel-mix weights and cond is scalar ->
        #      fold cos(t) into per-step weights, cond + 1/alpha_t into SMEM coefs,
        #      and run the ENTIRE loop in a single jitted fused pallas_call.
        if hasattr(model, "w") and np.isscalar(cond_val):
            w_np = np.asarray(model.w, dtype=np.float32)
            w_all = np.concatenate(
                [(w_np * np.cos(ts[i])).reshape(-1) for i in range(num_steps)]
            ).astype(np.float32)                                   # (S*C*C,)
            coefs_all = np.concatenate(
                [np.asarray([1.0 / alphas[i], sigmas[i], alphas[i + 1],
                             sigmas[i + 1], float(cond_val)], dtype=np.float32)
                 for i in range(num_steps)]
            ).astype(np.float32)                                   # (S*5,)

            run = jax.jit(functools.partial(fused_sample, num_steps=num_steps))
            return run(x, jnp.asarray(w_all), jnp.asarray(coefs_all))

        # ---- generic fallback: black-box model + tiled Pallas DDIM update.
        # TODO(synk): tensor-valued cond must already be folded into the model's eps
        # (it is, via model(...)), so only the elementwise update is a kernel here.
        for i in range(num_steps):
            t = float(ts[i])
            eps = model(x, t, **model_kwargs)
            coefs4 = jnp.asarray(
                [1.0 / float(alphas[i]), float(sigmas[i]),
                 float(alphas[i + 1]), float(sigmas[i + 1])], dtype=jnp.float32)
            x = ddim_update(x, eps, coefs4)
        return x


# ----------------------------------------------------------------------------
# pure-jnp reference for correctness checking
# ----------------------------------------------------------------------------
def _reference_sample(w, z, ts, alphas, sigmas, cond, num_steps):
    x = jnp.asarray(z, dtype=jnp.float32)
    wj = jnp.asarray(w, dtype=jnp.float32)
    for i in range(num_steps):
        eps = jnp.einsum('ij,njhw->nihw', wj, x) * jnp.cos(jnp.float32(ts[i])) + cond
        x0 = jnp.clip((x - sigmas[i] * eps) / alphas[i], -1.0, 1.0)
        x = alphas[i + 1] * x0 + sigmas[i + 1] * eps
    return x


if __name__ == "__main__":
    key = jax.random.PRNGKey(0)
    shape = (2, 4, 16, 16)            # N, C, H, W  (H*W = 256 = 2 * 128 lanes)
    n, c, h, w = shape

    model = ToyDenoiser(c)
    z = jax.random.normal(key, shape, dtype=jnp.float32)

    sampler = Sampler(num_steps=4)

    # fast path: whole sampling loop in a single fused pallas_call
    out_fused = jax.block_until_ready(sampler(model, {"cond": 0.0}, shape, z=z))

    # fallback path (black-box model) exercises the tiled ddim_update kernel
    generic_model = lambda xx, tt, **kw: model(xx, tt, **kw)   # no `.w` attribute
    out_generic = jax.block_until_ready(sampler(generic_model, {"cond": 0.0}, shape, z=z))

    # pure-jnp reference
    ts, alphas, sigmas = sampler._schedule()
    ref = jax.block_until_ready(
        _reference_sample(model.w, z, ts, alphas, sigmas, 0.0, sampler.num_steps))

    assert out_fused.shape == shape and out_fused.dtype == jnp.float32
    assert bool(jnp.all(jnp.isfinite(out_fused)))
    np.testing.assert_allclose(np.asarray(out_fused), np.asarray(ref),
                               rtol=1e-4, atol=1e-5)
    np.testing.assert_allclose(np.asarray(out_generic), np.asarray(ref),
                               rtol=1e-4, atol=1e-5)
    print("KERNEL_OK")
</pallas_src>

<mosaic_0001>
module attributes {stable_mosaic.version = 11 : i64} {
  func.func @_fused_sample_kernel(%arg0: i32, %arg1: i32, %arg2: memref<64xf32, #tpu.memory_space<smem>>, %arg3: memref<20xf32, #tpu.memory_space<smem>>, %arg4: memref<1x4x256xf32, #tpu.memory_space<vmem>>, %arg5: memref<1x4x256xf32, #tpu.memory_space<vmem>>) attributes {dimension_semantics = [#tpu.dimension_semantics<parallel>, #tpu.dimension_semantics<parallel>], iteration_bounds = array<i64: 2, 1>, scalar_prefetch = 0 : i64, scratch_operands = 0 : i64, tpu.core_type = #tpu.core_type<tc>, window_params = [{transform_indices = @transform_0, window_bounds = array<i64: 64>}, {transform_indices = @transform_1, window_bounds = array<i64: 20>}, {transform_indices = @transform_2, window_bounds = array<i64: 1, 4, 256>}, {transform_indices = @transform_3, window_bounds = array<i64: 1, 4, 256>}]} {
    %c0 = arith.constant 0 : index
    %c0_0 = arith.constant 0 : index
    %c0_1 = arith.constant 0 : index
    %0 = vector.load %arg4[%c0, %c0_0, %c0_1] : memref<1x4x256xf32, #tpu.memory_space<vmem>>, vector<1x4x256xf32>
    %1 = vector.shape_cast %0 : vector<1x4x256xf32> to vector<4x256xf32>
    %2 = vector.extract_strided_slice %1 {offsets = [0, 0], sizes = [1, 256], strides = [1, 1]} : vector<4x256xf32> to vector<1x256xf32>
    %3 = vector.extract_strided_slice %1 {offsets = [1, 0], sizes = [1, 256], strides = [1, 1]} : vector<4x256xf32> to vector<1x256xf32>
    %4 = vector.extract_strided_slice %1 {offsets = [2, 0], sizes = [1, 256], strides = [1, 1]} : vector<4x256xf32> to vector<1x256xf32>
    %5 = vector.extract_strided_slice %1 {offsets = [3, 0], sizes = [1, 256], strides = [1, 1]} : vector<4x256xf32> to vector<1x256xf32>
    %c0_2 = arith.constant 0 : index
    %6 = memref.load %arg3[%c0_2] : memref<20xf32, #tpu.memory_space<smem>>
    %c1 = arith.constant 1 : index
    %7 = memref.load %arg3[%c1] : memref<20xf32, #tpu.memory_space<smem>>
    %c2 = arith.constant 2 : index
    %8 = memref.load %arg3[%c2] : memref<20xf32, #tpu.memory_space<smem>>
    %c3 = arith.constant 3 : index
    %9 = memref.load %arg3[%c3] : memref<20xf32, #tpu.memory_space<smem>>
    %c4 = arith.constant 4 : index
    %10 = memref.load %arg3[%c4] : memref<20xf32, #tpu.memory_space<smem>>
    %c0_3 = arith.constant 0 : index
    %11 = memref.load %arg2[%c0_3] : memref<64xf32, #tpu.memory_space<smem>>
    %12 = vector.broadcast %11 : f32 to vector<1x256xf32>
    %13 = arith.mulf %12, %2 : vector<1x256xf32>
    %c1_4 = arith.constant 1 : index
    %14 = memref.load %arg2[%c1_4] : memref<64xf32, #tpu.memory_space<smem>>
    %15 = vector.broadcast %14 : f32 to vector<1x256xf32>
    %16 = arith.mulf %15, %3 : vector<1x256xf32>
    %17 = arith.addf %13, %16 : vector<1x256xf32>
    %c2_5 = arith.constant 2 : index
    %18 = memref.load %arg2[%c2_5] : memref<64xf32, #tpu.memory_space<smem>>
    %19 = vector.broadcast %18 : f32 to vector<1x256xf32>
    %20 = arith.mulf %19, %4 : vector<1x256xf32>
    %21 = arith.addf %17, %20 : vector<1x256xf32>
    %c3_6 = arith.constant 3 : index
    %22 = memref.load %arg2[%c3_6] : memref<64xf32, #tpu.memory_space<smem>>
    %23 = vector.broadcast %22 : f32 to vector<1x256xf32>
    %24 = arith.mulf %23, %5 : vector<1x256xf32>
    %25 = arith.addf %21, %24 : vector<1x256xf32>
    %26 = vector.broadcast %10 : f32 to vector<1x256xf32>
    %27 = arith.addf %25, %26 : vector<1x256xf32>
    %c4_7 = arith.constant 4 : index
    %28 = memref.load %arg2[%c4_7] : memref<64xf32, #tpu.memory_space<smem>>
    %29 = vector.broadcast %28 : f32 to vector<1x256xf32>
    %30 = arith.mulf %29, %2 : vector<1x256xf32>
    %c5 = arith.constant 5 : index
    %31 = memref.load %arg2[%c5] : memref<64xf32, #tpu.memory_space<smem>>
    %32 = vector.broadcast %31 : f32 to vector<1x256xf32>
    %33 = arith.mulf %32, %3 : vector<1x256xf32>
    %34 = arith.addf %30, %33 : vector<1x256xf32>
    %c6 = arith.constant 6 : index
    %35 = memref.load %arg2[%c6] : memref<64xf32, #tpu.memory_space<smem>>
    %36 = vector.broadcast %35 : f32 to vector<1x256xf32>
    %37 = arith.mulf %36, %4 : vector<1x256xf32>
    %38 = arith.addf %34, %37 : vector<1x256xf32>
    %c7 = arith.constant 7 : index
    %39 = memref.load %arg2[%c7] : memref<64xf32, #tpu.memory_space<smem>>
    %40 = vector.broadcast %39 : f32 to vector<1x256xf32>
    %41 = arith.mulf %40, %5 : vector<1x256xf32>
    %42 = arith.addf %38, %41 : vector<1x256xf32>
    %43 = vector.broadcast %10 : f32 to vector<1x256xf32>
    %44 = arith.addf %42, %43 : vector<1x256xf32>
    %c8 = arith.constant 8 : index
    %45 = memref.load %arg2[%c8] : memref<64xf32, #tpu.memory_space<smem>>
    %46 = vector.broadcast %45 : f32 to vector<1x256xf32>
    %47 = arith.mulf %46, %2 : vector<1x256xf32>
    %c9 = arith.constant 9 : index
    %48 = memref.load %arg2[%c9] : memref<64xf32, #tpu.memory_space<smem>>
    %49 = vector.broadcast %48 : f32 to vector<1x256xf32>
    %50 = arith.mulf %49, %3 : vector<1x256xf32>
    %51 = arith.addf %47, %50 : vector<1x256xf32>
    %c10 = arith.constant 10 : index
    %52 = memref.load %arg2[%c10] : memref<64xf32, #tpu.memory_space<smem>>
    %53 = vector.broadcast %52 : f32 to vector<1x256xf32>
    %54 = arith.mulf %53, %4 : vector<1x256xf32>
    %55 = arith.addf %51, %54 : vector<1x256xf32>
    %c11 = arith.constant 11 : index
    %56 = memref.load %arg2[%c11] : memref<64xf32, #tpu.memory_space<smem>>
    %57 = vector.broadcast %56 : f32 to vector<1x256xf32>
    %58 = arith.mulf %57, %5 : vector<1x256xf32>
    %59 = arith.addf %55, %58 : vector<1x256xf32>
    %60 = vector.broadcast %10 : f32 to vector<1x256xf32>
    %61 = arith.addf %59, %60 : vector<1x256xf32>
    %c12 = arith.constant 12 : index
    %62 = memref.load %arg2[%c12] : memref<64xf32, #tpu.memory_space<smem>>
    %63 = vector.broadcast %62 : f32 to vector<1x256xf32>
    %64 = arith.mulf %63, %2 : vector<1x256xf32>
    %c13 = arith.constant 13 : index
    %65 = memref.load %arg2[%c13] : memref<64xf32, #tpu.memory_space<smem>>
    %66 = vector.broadcast %65 : f32 to vector<1x256xf32>
    %67 = arith.mulf %66, %3 : vector<1x256xf32>
    %68 = arith.addf %64, %67 : vector<1x256xf32>
    %c14 = arith.constant 14 : index
    %69 = memref.load %arg2[%c14] : memref<64xf32, #tpu.memory_space<smem>>
    %70 = vector.broadcast %69 : f32 to vector<1x256xf32>
    %71 = arith.mulf %70, %4 : vector<1x256xf32>
    %72 = arith.addf %68, %71 : vector<1x256xf32>
    %c15 = arith.constant 15 : index
    %73 = memref.load %arg2[%c15] : memref<64xf32, #tpu.memory_space<smem>>
    %74 = vector.broadcast %73 : f32 to vector<1x256xf32>
    %75 = arith.mulf %74, %5 : vector<1x256xf32>
    %76 = arith.addf %72, %75 : vector<1x256xf32>
    %77 = vector.broadcast %10 : f32 to vector<1x256xf32>
    %78 = arith.addf %76, %77 : vector<1x256xf32>
    %79 = vector.broadcast %7 : f32 to vector<1x256xf32>
    %80 = arith.mulf %79, %27 : vector<1x256xf32>
    %81 = arith.subf %2, %80 : vector<1x256xf32>
    %82 = vector.broadcast %6 : f32 to vector<1x256xf32>
    %83 = arith.mulf %81, %82 : vector<1x256xf32>
    %cst = arith.constant -1.000000e+00 : f32
    %cst_8 = arith.constant 1.000000e+00 : f32
    %84 = vector.broadcast %cst : f32 to vector<1x256xf32>
    %85 = arith.maximumf %84, %83 : vector<1x256xf32>
    %86 = vector.broadcast %cst_8 : f32 to vector<1x256xf32>
    %87 = arith.minimumf %86, %85 : vector<1x256xf32>
    %88 = vector.broadcast %8 : f32 to vector<1x256xf32>
    %89 = arith.mulf %88, %87 : vector<1x256xf32>
    %90 = vector.broadcast %9 : f32 to vector<1x256xf32>
    %91 = arith.mulf %90, %27 : vector<1x256xf32>
    %92 = arith.addf %89, %91 : vector<1x256xf32>
    %93 = vector.broadcast %7 : f32 to vector<1x256xf32>
    %94 = arith.mulf %93, %44 : vector<1x256xf32>
    %95 = arith.subf %3, %94 : vector<1x256xf32>
    %96 = vector.broadcast %6 : f32 to vector<1x256xf32>
    %97 = arith.mulf %95, %96 : vector<1x256xf32>
    %cst_9 = arith.constant -1.000000e+00 : f32
    %cst_10 = arith.constant 1.000000e+00 : f32
    %98 = vector.broadcast %cst_9 : f32 to vector<1x256xf32>
    %99 = arith.maximumf %98, %97 : vector<1x256xf32>
    %100 = vector.broadcast %cst_10 : f32 to vector<1x256xf32>
    %101 = arith.minimumf %100, %99 : vector<1x256xf32>
    %102 = vector.broadcast %8 : f32 to vector<1x256xf32>
    %103 = arith.mulf %102, %101 : vector<1x256xf32>
    %104 = vector.broadcast %9 : f32 to vector<1x256xf32>
    %105 = arith.mulf %104, %44 : vector<1x256xf32>
    %106 = arith.addf %103, %105 : vector<1x256xf32>
    %107 = vector.broadcast %7 : f32 to vector<1x256xf32>
    %108 = arith.mulf %107, %61 : vector<1x256xf32>
    %109 = arith.subf %4, %108 : vector<1x256xf32>
    %110 = vector.broadcast %6 : f32 to vector<1x256xf32>
    %111 = arith.mulf %109, %110 : vector<1x256xf32>
    %cst_11 = arith.constant -1.000000e+00 : f32
    %cst_12 = arith.constant 1.000000e+00 : f32
    %112 = vector.broadcast %cst_11 : f32 to vector<1x256xf32>
    %113 = arith.maximumf %112, %111 : vector<1x256xf32>
    %114 = vector.broadcast %cst_12 : f32 to vector<1x256xf32>
    %115 = arith.minimumf %114, %113 : vector<1x256xf32>
    %116 = vector.broadcast %8 : f32 to vector<1x256xf32>
    %117 = arith.mulf %116, %115 : vector<1x256xf32>
    %118 = vector.broadcast %9 : f32 to vector<1x256xf32>
    %119 = arith.mulf %118, %61 : vector<1x256xf32>
    %120 = arith.addf %117, %119 : vector<1x256xf32>
    %121 = vector.broadcast %7 : f32 to vector<1x256xf32>
    %122 = arith.mulf %121, %78 : vector<1x256xf32>
    %123 = arith.subf %5, %122 : vector<1x256xf32>
    %124 = vector.broadcast %6 : f32 to vector<1x256xf32>
    %125 = arith.mulf %123, %124 : vector<1x256xf32>
    %cst_13 = arith.constant -1.000000e+00 : f32
    %cst_14 = arith.constant 1.000000e+00 : f32
    %126 = vector.broadcast %cst_13 : f32 to vector<1x256xf32>
    %127 = arith.maximumf %126, %125 : vector<1x256xf32>
    %128 = vector.broadcast %cst_14 : f32 to vector<1x256xf32>
    %129 = arith.minimumf %128, %127 : vector<1x256xf32>
    %130 = vector.broadcast %8 : f32 to vector<1x256xf32>
    %131 = arith.mulf %130, %129 : vector<1x256xf32>
    %132 = vector.broadcast %9 : f32 to vector<1x256xf32>
    %133 = arith.mulf %132, %78 : vector<1x256xf32>
    %134 = arith.addf %131, %133 : vector<1x256xf32>
    %c5_15 = arith.constant 5 : index
    %135 = memref.load %arg3[%c5_15] : memref<20xf32, #tpu.memory_space<smem>>
    %c6_16 = arith.constant 6 : index
    %136 = memref.load %arg3[%c6_16] : memref<20xf32, #tpu.memory_space<smem>>
    %c7_17 = arith.constant 7 : index
    %137 = memref.load %arg3[%c7_17] : memref<20xf32, #tpu.memory_space<smem>>
    %c8_18 = arith.constant 8 : index
    %138 = memref.load %arg3[%c8_18] : memref<20xf32, #tpu.memory_space<smem>>
    %c9_19 = arith.constant 9 : index
    %139 = memref.load %arg3[%c9_19] : memref<20xf32, #tpu.memory_space<smem>>
    %c16 = arith.constant 16 : index
    %140 = memref.load %arg2[%c16] : memref<64xf32, #tpu.memory_space<smem>>
    %141 = vector.broadcast %140 : f32 to vector<1x256xf32>
    %142 = arith.mulf %141, %92 : vector<1x256xf32>
    %c17 = arith.constant 17 : index
    %143 = memref.load %arg2[%c17] : memref<64xf32, #tpu.memory_space<smem>>
    %144 = vector.broadcast %143 : f32 to vector<1x256xf32>
    %145 = arith.mulf %144, %106 : vector<1x256xf32>
    %146 = arith.addf %142, %145 : vector<1x256xf32>
    %c18 = arith.constant 18 : index
    %147 = memref.load %arg2[%c18] : memref<64xf32, #tpu.memory_space<smem>>
    %148 = vector.broadcast %147 : f32 to vector<1x256xf32>
    %149 = arith.mulf %148, %120 : vector<1x256xf32>
    %150 = arith.addf %146, %149 : vector<1x256xf32>
    %c19 = arith.constant 19 : index
    %151 = memref.load %arg2[%c19] : memref<64xf32, #tpu.memory_space<smem>>
    %152 = vector.broadcast %151 : f32 to vector<1x256xf32>
    %153 = arith.mulf %152, %134 : vector<1x256xf32>
    %154 = arith.addf %150, %153 : vector<1x256xf32>
    %155 = vector.broadcast %139 : f32 to vector<1x256xf32>
    %156 = arith.addf %154, %155 : vector<1x256xf32>
    %c20 = arith.constant 20 : index
    %157 = memref.load %arg2[%c20] : memref<64xf32, #tpu.memory_space<smem>>
    %158 = vector.broadcast %157 : f32 to vector<1x256xf32>
    %159 = arith.mulf %158, %92 : vector<1x256xf32>
    %c21 = arith.constant 21 : index
    %160 = memref.load %arg2[%c21] : memref<64xf32, #tpu.memory_space<smem>>
    %161 = vector.broadcast %160 : f32 to vector<1x256xf32>
    %162 = arith.mulf %161, %106 : vector<1x256xf32>
    %163 = arith.addf %159, %162 : vector<1x256xf32>
    %c22 = arith.constant 22 : index
    %164 = memref.load %arg2[%c22] : memref<64xf32, #tpu.memory_space<smem>>
    %165 = vector.broadcast %164 : f32 to vector<1x256xf32>
    %166 = arith.mulf %165, %120 : vector<1x256xf32>
    %167 = arith.addf %163, %166 : vector<1x256xf32>
    %c23 = arith.constant 23 : index
    %168 = memref.load %arg2[%c23] : memref<64xf32, #tpu.memory_space<smem>>
    %169 = vector.broadcast %168 : f32 to vector<1x256xf32>
    %170 = arith.mulf %169, %134 : vector<1x256xf32>
    %171 = arith.addf %167, %170 : vector<1x256xf32>
    %172 = vector.broadcast %139 : f32 to vector<1x256xf32>
    %173 = arith.addf %171, %172 : vector<1x256xf32>
    %c24 = arith.constant 24 : index
    %174 = memref.load %arg2[%c24] : memref<64xf32, #tpu.memory_space<smem>>
    %175 = vector.broadcast %174 : f32 to vector<1x256xf32>
    %176 = arith.mulf %175, %92 : vector<1x256xf32>
    %c25 = arith.constant 25 : index
    %177 = memref.load %arg2[%c25] : memref<64xf32, #tpu.memory_space<smem>>
    %178 = vector.broadcast %177 : f32 to vector<1x256xf32>
    %179 = arith.mulf %178, %106 : vector<1x256xf32>
    %180 = arith.addf %176, %179 : vector<1x256xf32>
    %c26 = arith.constant 26 : index
    %181 = memref.load %arg2[%c26] : memref<64xf32, #tpu.memory_space<smem>>
    %182 = vector.broadcast %181 : f32 to vector<1x256xf32>
    %183 = arith.mulf %182, %120 : vector<1x256xf32>
    %184 = arith.addf %180, %183 : vector<1x256xf32>
    %c27 = arith.constant 27 : index
    %185 = memref.load %arg2[%c27] : memref<64xf32, #tpu.memory_space<smem>>
    %186 = vector.broadcast %185 : f32 to vector<1x256xf32>
    %187 = arith.mulf %186, %134 : vector<1x256xf32>
    %188 = arith.addf %184, %187 : vector<1x256xf32>
    %189 = vector.broadcast %139 : f32 to vector<1x256xf32>
    %190 = arith.addf %188, %189 : vector<1x256xf32>
    %c28 = arith.constant 28 : index
    %191 = memref.load %arg2[%c28] : memref<64xf32, #tpu.memory_space<smem>>
    %192 = vector.broadcast %191 : f32 to vector<1x256xf32>
    %193 = arith.mulf %192, %92 : vector<1x256xf32>
    %c29 = arith.constant 29 : index
    %194 = memref.load %arg2[%c29] : memref<64xf32, #tpu.memory_space<smem>>
    %195 = vector.broadcast %194 : f32 to vector<1x256xf32>
    %196 = arith.mulf %195, %106 : vector<1x256xf32>
    %197 = arith.addf %193, %196 : vector<1x256xf32>
    %c30 = arith.constant 30 : index
    %198 = memref.load %arg2[%c30] : memref<64xf32, #tpu.memory_space<smem>>
    %199 = vector.broadcast %198 : f32 to vector<1x256xf32>
    %200 = arith.mulf %199, %120 : vector<1x256xf32>
    %201 = arith.addf %197, %200 : vector<1x256xf32>
    %c31 = arith.constant 31 : index
    %202 = memref.load %arg2[%c31] : memref<64xf32, #tpu.memory_space<smem>>
    %203 = vector.broadcast %202 : f32 to vector<1x256xf32>
    %204 = arith.mulf %203, %134 : vector<1x256xf32>
    %205 = arith.addf %201, %204 : vector<1x256xf32>
    %206 = vector.broadcast %139 : f32 to vector<1x256xf32>
    %207 = arith.addf %205, %206 : vector<1x256xf32>
    %208 = vector.broadcast %136 : f32 to vector<1x256xf32>
    %209 = arith.mulf %208, %156 : vector<1x256xf32>
    %210 = arith.subf %92, %209 : vector<1x256xf32>
    %211 = vector.broadcast %135 : f32 to vector<1x256xf32>
    %212 = arith.mulf %210, %211 : vector<1x256xf32>
    %cst_20 = arith.constant -1.000000e+00 : f32
    %cst_21 = arith.constant 1.000000e+00 : f32
    %213 = vector.broadcast %cst_20 : f32 to vector<1x256xf32>
    %214 = arith.maximumf %213, %212 : vector<1x256xf32>
    %215 = vector.broadcast %cst_21 : f32 to vector<1x256xf32>
    %216 = arith.minimumf %215, %214 : vector<1x256xf32>
    %217 = vector.broadcast %137 : f32 to vector<1x256xf32>
    %218 = arith.mulf %217, %216 : vector<1x256xf32>
    %219 = vector.broadcast %138 : f32 to vector<1x256xf32>
    %220 = arith.mulf %219, %156 : vector<1x256xf32>
    %221 = arith.addf %218, %220 : vector<1x256xf32>
    %222 = vector.broadcast %136 : f32 to vector<1x256xf32>
    %223 = arith.mulf %222, %173 : vector<1x256xf32>
    %224 = arith.subf %106, %223 : vector<1x256xf32>
    %225 = vector.broadcast %135 : f32 to vector<1x256xf32>
    %226 = arith.mulf %224, %225 : vector<1x256xf32>
    %cst_22 = arith.constant -1.000000e+00 : f32
    %cst_23 = arith.constant 1.000000e+00 : f32
    %227 = vector.broadcast %cst_22 : f32 to vector<1x256xf32>
    %228 = arith.maximumf %227, %226 : vector<1x256xf32>
    %229 = vector.broadcast %cst_23 : f32 to vector<1x256xf32>
    %230 = arith.minimumf %229, %228 : vector<1x256xf32>
    %231 = vector.broadcast %137 : f32 to vector<1x256xf32>
    %232 = arith.mulf %231, %230 : vector<1x256xf32>
    %233 = vector.broadcast %138 : f32 to vector<1x256xf32>
    %234 = arith.mulf %233, %173 : vector<1x256xf32>
    %235 = arith.addf %232, %234 : vector<1x256xf32>
    %236 = vector.broadcast %136 : f32 to vector<1x256xf32>
    %237 = arith.mulf %236, %190 : vector<1x256xf32>
    %238 = arith.subf %120, %237 : vector<1x256xf32>
    %239 = vector.broadcast %135 : f32 to vector<1x256xf32>
    %240 = arith.mulf %238, %239 : vector<1x256xf32>
    %cst_24 = arith.constant -1.000000e+00 : f32
    %cst_25 = arith.constant 1.000000e+00 : f32
    %241 = vector.broadcast %cst_24 : f32 to vector<1x256xf32>
    %242 = arith.maximumf %241, %240 : vector<1x256xf32>
    %243 = vector.broadcast %cst_25 : f32 to vector<1x256xf32>
    %244 = arith.minimumf %243, %242 : vector<1x256xf32>
    %245 = vector.broadcast %137 : f32 to vector<1x256xf32>
    %246 = arith.mulf %245, %244 : vector<1x256xf32>
    %247 = vector.broadcast %138 : f32 to vector<1x256xf32>
    %248 = arith.mulf %247, %190 : vector<1x256xf32>
    %249 = arith.addf %246, %248 : vector<1x256xf32>
    %250 = vector.broadcast %136 : f32 to vector<1x256xf32>
    %251 = arith.mulf %250, %207 : vector<1x256xf32>
    %252 = arith.subf %134, %251 : vector<1x256xf32>
    %253 = vector.broadcast %135 : f32 to vector<1x256xf32>
    %254 = arith.mulf %252, %253 : vector<1x256xf32>
    %cst_26 = arith.constant -1.000000e+00 : f32
    %cst_27 = arith.constant 1.000000e+00 : f32
    %255 = vector.broadcast %cst_26 : f32 to vector<1x256xf32>
    %256 = arith.maximumf %255, %254 : vector<1x256xf32>
    %257 = vector.broadcast %cst_27 : f32 to vector<1x256xf32>
    %258 = arith.minimumf %257, %256 : vector<1x256xf32>
    %259 = vector.broadcast %137 : f32 to vector<1x256xf32>
    %260 = arith.mulf %259, %258 : vector<1x256xf32>
    %261 = vector.broadcast %138 : f32 to vector<1x256xf32>
    %262 = arith.mulf %261, %207 : vector<1x256xf32>
    %263 = arith.addf %260, %262 : vector<1x256xf32>
    %c10_28 = arith.constant 10 : index
    %264 = memref.load %arg3[%c10_28] : memref<20xf32, #tpu.memory_space<smem>>
    %c11_29 = arith.constant 11 : index
    %265 = memref.load %arg3[%c11_29] : memref<20xf32, #tpu.memory_space<smem>>
    %c12_30 = arith.constant 12 : index
    %266 = memref.load %arg3[%c12_30] : memref<20xf32, #tpu.memory_space<smem>>
    %c13_31 = arith.constant 13 : index
    %267 = memref.load %arg3[%c13_31] : memref<20xf32, #tpu.memory_space<smem>>
    %c14_32 = arith.constant 14 : index
    %268 = memref.load %arg3[%c14_32] : memref<20xf32, #tpu.memory_space<smem>>
    %c32 = arith.constant 32 : index
    %269 = memref.load %arg2[%c32] : memref<64xf32, #tpu.memory_space<smem>>
    %270 = vector.broadcast %269 : f32 to vector<1x256xf32>
    %271 = arith.mulf %270, %221 : vector<1x256xf32>
    %c33 = arith.constant 33 : index
    %272 = memref.load %arg2[%c33] : memref<64xf32, #tpu.memory_space<smem>>
    %273 = vector.broadcast %272 : f32 to vector<1x256xf32>
    %274 = arith.mulf %273, %235 : vector<1x256xf32>
    %275 = arith.addf %271, %274 : vector<1x256xf32>
    %c34 = arith.constant 34 : index
    %276 = memref.load %arg2[%c34] : memref<64xf32, #tpu.memory_space<smem>>
    %277 = vector.broadcast %276 : f32 to vector<1x256xf32>
    %278 = arith.mulf %277, %249 : vector<1x256xf32>
    %279 = arith.addf %275, %278 : vector<1x256xf32>
    %c35 = arith.constant 35 : index
    %280 = memref.load %arg2[%c35] : memref<64xf32, #tpu.memory_space<smem>>
    %281 = vector.broadcast %280 : f32 to vector<1x256xf32>
    %282 = arith.mulf %281, %263 : vector<1x256xf32>
    %283 = arith.addf %279, %282 : vector<1x256xf32>
    %284 = vector.broadcast %268 : f32 to vector<1x256xf32>
    %285 = arith.addf %283, %284 : vector<1x256xf32>
    %c36 = arith.constant 36 : index
    %286 = memref.load %arg2[%c36] : memref<64xf32, #tpu.memory_space<smem>>
    %287 = vector.broadcast %286 : f32 to vector<1x256xf32>
    %288 = arith.mulf %287, %221 : vector<1x256xf32>
    %c37 = arith.constant 37 : index
    %289 = memref.load %arg2[%c37] : memref<64xf32, #tpu.memory_space<smem>>
    %290 = vector.broadcast %289 : f32 to vector<1x256xf32>
    %291 = arith.mulf %290, %235 : vector<1x256xf32>
    %292 = arith.addf %288, %291 : vector<1x256xf32>
    %c38 = arith.constant 38 : index
    %293 = memref.load %arg2[%c38] : memref<64xf32, #tpu.memory_space<smem>>
    %294 = vector.broadcast %293 : f32 to vector<1x256xf32>
    %295 = arith.mulf %294, %249 : vector<1x256xf32>
    %296 = arith.addf %292, %295 : vector<1x256xf32>
    %c39 = arith.constant 39 : index
    %297 = memref.load %arg2[%c39] : memref<64xf32, #tpu.memory_space<smem>>
    %298 = vector.broadcast %297 : f32 to vector<1x256xf32>
    %299 = arith.mulf %298, %263 : vector<1x256xf32>
    %300 = arith.addf %296, %299 : vector<1x256xf32>
    %301 = vector.broadcast %268 : f32 to vector<1x256xf32>
    %302 = arith.addf %300, %301 : vector<1x256xf32>
    %c40 = arith.constant 40 : index
    %303 = memref.load %arg2[%c40] : memref<64xf32, #tpu.memory_space<smem>>
    %304 = vector.broadcast %303 : f32 to vector<1x256xf32>
    %305 = arith.mulf %304, %221 : vector<1x256xf32>
    %c41 = arith.constant 41 : index
    %306 = memref.load %arg2[%c41] : memref<64xf32, #tpu.memory_space<smem>>
    %307 = vector.broadcast %306 : f32 to vector<1x256xf32>
    %308 = arith.mulf %307, %235 : vector<1x256xf32>
    %309 = arith.addf %305, %308 : vector<1x256xf32>
    %c42 = arith.constant 42 : index
    %310 = memref.load %arg2[%c42] : memref<64xf32, #tpu.memory_space<smem>>
    %311 = vector.broadcast %310 : f32 to vector<1x256xf32>
    %312 = arith.mulf %311, %249 : vector<1x256xf32>
    %313 = arith.addf %309, %312 : vector<1x256xf32>
    %c43 = arith.constant 43 : index
    %314 = memref.load %arg2[%c43] : memref<64xf32, #tpu.memory_space<smem>>
    %315 = vector.broadcast %314 : f32 to vector<1x256xf32>
    %316 = arith.mulf %315, %263 : vector<1x256xf32>
    %317 = arith.addf %313, %316 : vector<1x256xf32>
    %318 = vector.broadcast %268 : f32 to vector<1x256xf32>
    %319 = arith.addf %317, %318 : vector<1x256xf32>
    %c44 = arith.constant 44 : index
    %320 = memref.load %arg2[%c44] : memref<64xf32, #tpu.memory_space<smem>>
    %321 = vector.broadcast %320 : f32 to vector<1x256xf32>
    %322 = arith.mulf %321, %221 : vector<1x256xf32>
    %c45 = arith.constant 45 : index
    %323 = memref.load %arg2[%c45] : memref<64xf32, #tpu.memory_space<smem>>
    %324 = vector.broadcast %323 : f32 to vector<1x256xf32>
    %325 = arith.mulf %324, %235 : vector<1x256xf32>
    %326 = arith.addf %322, %325 : vector<1x256xf32>
    %c46 = arith.constant 46 : index
    %327 = memref.load %arg2[%c46] : memref<64xf32, #tpu.memory_space<smem>>
    %328 = vector.broadcast %327 : f32 to vector<1x256xf32>
    %329 = arith.mulf %328, %249 : vector<1x256xf32>
    %330 = arith.addf %326, %329 : vector<1x256xf32>
    %c47 = arith.constant 47 : index
    %331 = memref.load %arg2[%c47] : memref<64xf32, #tpu.memory_space<smem>>
    %332 = vector.broadcast %331 : f32 to vector<1x256xf32>
    %333 = arith.mulf %332, %263 : vector<1x256xf32>
    %334 = arith.addf %330, %333 : vector<1x256xf32>
    %335 = vector.broadcast %268 : f32 to vector<1x256xf32>
    %336 = arith.addf %334, %335 : vector<1x256xf32>
    %337 = vector.broadcast %265 : f32 to vector<1x256xf32>
    %338 = arith.mulf %337, %285 : vector<1x256xf32>
    %339 = arith.subf %221, %338 : vector<1x256xf32>
    %340 = vector.broadcast %264 : f32 to vector<1x256xf32>
    %341 = arith.mulf %339, %340 : vector<1x256xf32>
    %cst_33 = arith.constant -1.000000e+00 : f32
    %cst_34 = arith.constant 1.000000e+00 : f32
    %342 = vector.broadcast %cst_33 : f32 to vector<1x256xf32>
    %343 = arith.maximumf %342, %341 : vector<1x256xf32>
    %344 = vector.broadcast %cst_34 : f32 to vector<1x256xf32>
    %345 = arith.minimumf %344, %343 : vector<1x256xf32>
    %346 = vector.broadcast %266 : f32 to vector<1x256xf32>
    %347 = arith.mulf %346, %345 : vector<1x256xf32>
    %348 = vector.broadcast %267 : f32 to vector<1x256xf32>
    %349 = arith.mulf %348, %285 : vector<1x256xf32>
    %350 = arith.addf %347, %349 : vector<1x256xf32>
    %351 = vector.broadcast %265 : f32 to vector<1x256xf32>
    %352 = arith.mulf %351, %302 : vector<1x256xf32>
    %353 = arith.subf %235, %352 : vector<1x256xf32>
    %354 = vector.broadcast %264 : f32 to vector<1x256xf32>
    %355 = arith.mulf %353, %354 : vector<1x256xf32>
    %cst_35 = arith.constant -1.000000e+00 : f32
    %cst_36 = arith.constant 1.000000e+00 : f32
    %356 = vector.broadcast %cst_35 : f32 to vector<1x256xf32>
    %357 = arith.maximumf %356, %355 : vector<1x256xf32>
    %358 = vector.broadcast %cst_36 : f32 to vector<1x256xf32>
    %359 = arith.minimumf %358, %357 : vector<1x256xf32>
    %360 = vector.broadcast %266 : f32 to vector<1x256xf32>
    %361 = arith.mulf %360, %359 : vector<1x256xf32>
    %362 = vector.broadcast %267 : f32 to vector<1x256xf32>
    %363 = arith.mulf %362, %302 : vector<1x256xf32>
    %364 = arith.addf %361, %363 : vector<1x256xf32>
    %365 = vector.broadcast %265 : f32 to vector<1x256xf32>
    %366 = arith.mulf %365, %319 : vector<1x256xf32>
    %367 = arith.subf %249, %366 : vector<1x256xf32>
    %368 = vector.broadcast %264 : f32 to vector<1x256xf32>
    %369 = arith.mulf %367, %368 : vector<1x256xf32>
    %cst_37 = arith.constant -1.000000e+00 : f32
    %cst_38 = arith.constant 1.000000e+00 : f32
    %370 = vector.broadcast %cst_37 : f32 to vector<1x256xf32>
    %371 = arith.maximumf %370, %369 : vector<1x256xf32>
    %372 = vector.broadcast %cst_38 : f32 to vector<1x256xf32>
    %373 = arith.minimumf %372, %371 : vector<1x256xf32>
    %374 = vector.broadcast %266 : f32 to vector<1x256xf32>
    %375 = arith.mulf %374, %373 : vector<1x256xf32>
    %376 = vector.broadcast %267 : f32 to vector<1x256xf32>
    %377 = arith.mulf %376, %319 : vector<1x256xf32>
    %378 = arith.addf %375, %377 : vector<1x256xf32>
    %379 = vector.broadcast %265 : f32 to vector<1x256xf32>
    %380 = arith.mulf %379, %336 : vector<1x256xf32>
    %381 = arith.subf %263, %380 : vector<1x256xf32>
    %382 = vector.broadcast %264 : f32 to vector<1x256xf32>
    %383 = arith.mulf %381, %382 : vector<1x256xf32>
    %cst_39 = arith.constant -1.000000e+00 : f32
    %cst_40 = arith.constant 1.000000e+00 : f32
    %384 = vector.broadcast %cst_39 : f32 to vector<1x256xf32>
    %385 = arith.maximumf %384, %383 : vector<1x256xf32>
    %386 = vector.broadcast %cst_40 : f32 to vector<1x256xf32>
    %387 = arith.minimumf %386, %385 : vector<1x256xf32>
    %388 = vector.broadcast %266 : f32 to vector<1x256xf32>
    %389 = arith.mulf %388, %387 : vector<1x256xf32>
    %390 = vector.broadcast %267 : f32 to vector<1x256xf32>
    %391 = arith.mulf %390, %336 : vector<1x256xf32>
    %392 = arith.addf %389, %391 : vector<1x256xf32>
    %c15_41 = arith.constant 15 : index
    %393 = memref.load %arg3[%c15_41] : memref<20xf32, #tpu.memory_space<smem>>
    %c16_42 = arith.constant 16 : index
    %394 = memref.load %arg3[%c16_42] : memref<20xf32, #tpu.memory_space<smem>>
    %c17_43 = arith.constant 17 : index
    %395 = memref.load %arg3[%c17_43] : memref<20xf32, #tpu.memory_space<smem>>
    %c18_44 = arith.constant 18 : index
    %396 = memref.load %arg3[%c18_44] : memref<20xf32, #tpu.memory_space<smem>>
    %c19_45 = arith.constant 19 : index
    %397 = memref.load %arg3[%c19_45] : memref<20xf32, #tpu.memory_space<smem>>
    %c48 = arith.constant 48 : index
    %398 = memref.load %arg2[%c48] : memref<64xf32, #tpu.memory_space<smem>>
    %399 = vector.broadcast %398 : f32 to vector<1x256xf32>
    %400 = arith.mulf %399, %350 : vector<1x256xf32>
    %c49 = arith.constant 49 : index
    %401 = memref.load %arg2[%c49] : memref<64xf32, #tpu.memory_space<smem>>
    %402 = vector.broadcast %401 : f32 to vector<1x256xf32>
    %403 = arith.mulf %402, %364 : vector<1x256xf32>
    %404 = arith.addf %400, %403 : vector<1x256xf32>
    %c50 = arith.constant 50 : index
    %405 = memref.load %arg2[%c50] : memref<64xf32, #tpu.memory_space<smem>>
    %406 = vector.broadcast %405 : f32 to vector<1x256xf32>
    %407 = arith.mulf %406, %378 : vector<1x256xf32>
    %408 = arith.addf %404, %407 : vector<1x256xf32>
    %c51 = arith.constant 51 : index
    %409 = memref.load %arg2[%c51] : memref<64xf32, #tpu.memory_space<smem>>
    %410 = vector.broadcast %409 : f32 to vector<1x256xf32>
    %411 = arith.mulf %410, %392 : vector<1x256xf32>
    %412 = arith.addf %408, %411 : vector<1x256xf32>
    %413 = vector.broadcast %397 : f32 to vector<1x256xf32>
    %414 = arith.addf %412, %413 : vector<1x256xf32>
    %c52 = arith.constant 52 : index
    %415 = memref.load %arg2[%c52] : memref<64xf32, #tpu.memory_space<smem>>
    %416 = vector.broadcast %415 : f32 to vector<1x256xf32>
    %417 = arith.mulf %416, %350 : vector<1x256xf32>
    %c53 = arith.constant 53 : index
    %418 = memref.load %arg2[%c53] : memref<64xf32, #tpu.memory_space<smem>>
    %419 = vector.broadcast %418 : f32 to vector<1x256xf32>
    %420 = arith.mulf %419, %364 : vector<1x256xf32>
    %421 = arith.addf %417, %420 : vector<1x256xf32>
    %c54 = arith.constant 54 : index
    %422 = memref.load %arg2[%c54] : memref<64xf32, #tpu.memory_space<smem>>
    %423 = vector.broadcast %422 : f32 to vector<1x256xf32>
    %424 = arith.mulf %423, %378 : vector<1x256xf32>
    %425 = arith.addf %421, %424 : vector<1x256xf32>
    %c55 = arith.constant 55 : index
    %426 = memref.load %arg2[%c55] : memref<64xf32, #tpu.memory_space<smem>>
    %427 = vector.broadcast %426 : f32 to vector<1x256xf32>
    %428 = arith.mulf %427, %392 : vector<1x256xf32>
    %429 = arith.addf %425, %428 : vector<1x256xf32>
    %430 = vector.broadcast %397 : f32 to vector<1x256xf32>
    %431 = arith.addf %429, %430 : vector<1x256xf32>
    %c56 = arith.constant 56 : index
    %432 = memref.load %arg2[%c56] : memref<64xf32, #tpu.memory_space<smem>>
    %433 = vector.broadcast %432 : f32 to vector<1x256xf32>
    %434 = arith.mulf %433, %350 : vector<1x256xf32>
    %c57 = arith.constant 57 : index
    %435 = memref.load %arg2[%c57] : memref<64xf32, #tpu.memory_space<smem>>
    %436 = vector.broadcast %435 : f32 to vector<1x256xf32>
    %437 = arith.mulf %436, %364 : vector<1x256xf32>
    %438 = arith.addf %434, %437 : vector<1x256xf32>
    %c58 = arith.constant 58 : index
    %439 = memref.load %arg2[%c58] : memref<64xf32, #tpu.memory_space<smem>>
    %440 = vector.broadcast %439 : f32 to vector<1x256xf32>
    %441 = arith.mulf %440, %378 : vector<1x256xf32>
    %442 = arith.addf %438, %441 : vector<1x256xf32>
    %c59 = arith.constant 59 : index
    %443 = memref.load %arg2[%c59] : memref<64xf32, #tpu.memory_space<smem>>
    %444 = vector.broadcast %443 : f32 to vector<1x256xf32>
    %445 = arith.mulf %444, %392 : vector<1x256xf32>
    %446 = arith.addf %442, %445 : vector<1x256xf32>
    %447 = vector.broadcast %397 : f32 to vector<1x256xf32>
    %448 = arith.addf %446, %447 : vector<1x256xf32>
    %c60 = arith.constant 60 : index
    %449 = memref.load %arg2[%c60] : memref<64xf32, #tpu.memory_space<smem>>
    %450 = vector.broadcast %449 : f32 to vector<1x256xf32>
    %451 = arith.mulf %450, %350 : vector<1x256xf32>
    %c61 = arith.constant 61 : index
    %452 = memref.load %arg2[%c61] : memref<64xf32, #tpu.memory_space<smem>>
    %453 = vector.broadcast %452 : f32 to vector<1x256xf32>
    %454 = arith.mulf %453, %364 : vector<1x256xf32>
    %455 = arith.addf %451, %454 : vector<1x256xf32>
    %c62 = arith.constant 62 : index
    %456 = memref.load %arg2[%c62] : memref<64xf32, #tpu.memory_space<smem>>
    %457 = vector.broadcast %456 : f32 to vector<1x256xf32>
    %458 = arith.mulf %457, %378 : vector<1x256xf32>
    %459 = arith.addf %455, %458 : vector<1x256xf32>
    %c63 = arith.constant 63 : index
    %460 = memref.load %arg2[%c63] : memref<64xf32, #tpu.memory_space<smem>>
    %461 = vector.broadcast %460 : f32 to vector<1x256xf32>
    %462 = arith.mulf %461, %392 : vector<1x256xf32>
    %463 = arith.addf %459, %462 : vector<1x256xf32>
    %464 = vector.broadcast %397 : f32 to vector<1x256xf32>
    %465 = arith.addf %463, %464 : vector<1x256xf32>
    %466 = vector.broadcast %394 : f32 to vector<1x256xf32>
    %467 = arith.mulf %466, %414 : vector<1x256xf32>
    %468 = arith.subf %350, %467 : vector<1x256xf32>
    %469 = vector.broadcast %393 : f32 to vector<1x256xf32>
    %470 = arith.mulf %468, %469 : vector<1x256xf32>
    %cst_46 = arith.constant -1.000000e+00 : f32
    %cst_47 = arith.constant 1.000000e+00 : f32
    %471 = vector.broadcast %cst_46 : f32 to vector<1x256xf32>
    %472 = arith.maximumf %471, %470 : vector<1x256xf32>
    %473 = vector.broadcast %cst_47 : f32 to vector<1x256xf32>
    %474 = arith.minimumf %473, %472 : vector<1x256xf32>
    %475 = vector.broadcast %395 : f32 to vector<1x256xf32>
    %476 = arith.mulf %475, %474 : vector<1x256xf32>
    %477 = vector.broadcast %396 : f32 to vector<1x256xf32>
    %478 = arith.mulf %477, %414 : vector<1x256xf32>
    %479 = arith.addf %476, %478 : vector<1x256xf32>
    %480 = vector.broadcast %394 : f32 to vector<1x256xf32>
    %481 = arith.mulf %480, %431 : vector<1x256xf32>
    %482 = arith.subf %364, %481 : vector<1x256xf32>
    %483 = vector.broadcast %393 : f32 to vector<1x256xf32>
    %484 = arith.mulf %482, %483 : vector<1x256xf32>
    %cst_48 = arith.constant -1.000000e+00 : f32
    %cst_49 = arith.constant 1.000000e+00 : f32
    %485 = vector.broadcast %cst_48 : f32 to vector<1x256xf32>
    %486 = arith.maximumf %485, %484 : vector<1x256xf32>
    %487 = vector.broadcast %cst_49 : f32 to vector<1x256xf32>
    %488 = arith.minimumf %487, %486 : vector<1x256xf32>
    %489 = vector.broadcast %395 : f32 to vector<1x256xf32>
    %490 = arith.mulf %489, %488 : vector<1x256xf32>
    %491 = vector.broadcast %396 : f32 to vector<1x256xf32>
    %492 = arith.mulf %491, %431 : vector<1x256xf32>
    %493 = arith.addf %490, %492 : vector<1x256xf32>
    %494 = vector.broadcast %394 : f32 to vector<1x256xf32>
    %495 = arith.mulf %494, %448 : vector<1x256xf32>
    %496 = arith.subf %378, %495 : vector<1x256xf32>
    %497 = vector.broadcast %393 : f32 to vector<1x256xf32>
    %498 = arith.mulf %496, %497 : vector<1x256xf32>
    %cst_50 = arith.constant -1.000000e+00 : f32
    %cst_51 = arith.constant 1.000000e+00 : f32
    %499 = vector.broadcast %cst_50 : f32 to vector<1x256xf32>
    %500 = arith.maximumf %499, %498 : vector<1x256xf32>
    %501 = vector.broadcast %cst_51 : f32 to vector<1x256xf32>
    %502 = arith.minimumf %501, %500 : vector<1x256xf32>
    %503 = vector.broadcast %395 : f32 to vector<1x256xf32>
    %504 = arith.mulf %503, %502 : vector<1x256xf32>
    %505 = vector.broadcast %396 : f32 to vector<1x256xf32>
    %506 = arith.mulf %505, %448 : vector<1x256xf32>
    %507 = arith.addf %504, %506 : vector<1x256xf32>
    %508 = vector.broadcast %394 : f32 to vector<1x256xf32>
    %509 = arith.mulf %508, %465 : vector<1x256xf32>
    %510 = arith.subf %392, %509 : vector<1x256xf32>
    %511 = vector.broadcast %393 : f32 to vector<1x256xf32>
    %512 = arith.mulf %510, %511 : vector<1x256xf32>
    %cst_52 = arith.constant -1.000000e+00 : f32
    %cst_53 = arith.constant 1.000000e+00 : f32
    %513 = vector.broadcast %cst_52 : f32 to vector<1x256xf32>
    %514 = arith.maximumf %513, %512 : vector<1x256xf32>
    %515 = vector.broadcast %cst_53 : f32 to vector<1x256xf32>
    %516 = arith.minimumf %515, %514 : vector<1x256xf32>
    %517 = vector.broadcast %395 : f32 to vector<1x256xf32>
    %518 = arith.mulf %517, %516 : vector<1x256xf32>
    %519 = vector.broadcast %396 : f32 to vector<1x256xf32>
    %520 = arith.mulf %519, %465 : vector<1x256xf32>
    %521 = arith.addf %518, %520 : vector<1x256xf32>
    %522 = tpu.concatenate %479, %493, %507, %521 in 0 : vector<1x256xf32>, vector<1x256xf32>, vector<1x256xf32>, vector<1x256xf32> -> vector<4x256xf32>
    %c0_54 = arith.constant 0 : index
    %c0_55 = arith.constant 0 : index
    %c0_56 = arith.constant 0 : index
    %523 = vector.load %arg5[%c0_54, %c0_55, %c0_56] : memref<1x4x256xf32, #tpu.memory_space<vmem>>, vector<1x4x256xf32>
    %524 = vector.shape_cast %523 : vector<1x4x256xf32> to vector<4x256xf32>
    %525 = vector.shape_cast %522 : vector<4x256xf32> to vector<1x4x256xf32>
    tpu.vector_store %arg5[%c0_54, %c0_55, %c0_56], %525 {strides = array<i32>} : memref<1x4x256xf32, #tpu.memory_space<vmem>>, vector<1x4x256xf32>,
    return
  }
  func.func @transform_0(%arg0: i32, %arg1: i32) -> i32 {
    %c0_i32 = arith.constant 0 : i32
    %c0_i32_0 = arith.constant 0 : i32
    return %c0_i32 : i32
  }
  func.func @transform_1(%arg0: i32, %arg1: i32) -> i32 {
    %c0_i32 = arith.constant 0 : i32
    %c0_i32_0 = arith.constant 0 : i32
    return %c0_i32 : i32
  }
  func.func @transform_2(%arg0: i32, %arg1: i32) -> (i32, i32, i32) {
    %c0_i32 = arith.constant 0 : i32
    %c0_i32_0 = arith.constant 0 : i32
    return %arg0, %c0_i32, %arg1 : i32, i32, i32
  }
  func.func @transform_3(%arg0: i32, %arg1: i32) -> (i32, i32, i32) {
    %c0_i32 = arith.constant 0 : i32
    %c0_i32_0 = arith.constant 0 : i32
    return %arg0, %c0_i32, %arg1 : i32, i32, i32
  }
}

</mosaic_0001>

<bundles_post_ra>
// kernel: fused_sample.1
= control target key start
LH: loop header
LB: loop body
LE: loop exit
PB: predicated region body
PF: predicated region fallthrough
CT: control target
= control target key end

     0   :  { %8 = vsyncpa [#allocation3], 0  ;;  %s1754_s0 = inlined_call_operand.vmem [shape: f32[64], index: 0, kind: input, shape index: {}]   ;;  %s1755_s1 = inlined_call_operand.vmem [shape: f32[20], index: 1, kind: input, shape index: {}]   ;;  %s1756_s2 = inlined_call_operand.vmem [shape: f32[2,4,256], index: 2, kind: input, shape index: {}]   ;;  %s1757_s3 = inlined_call_operand.vmem [shape: f32[2,4,256], index: 3, kind: output, shape index: {}]  }
   0x1   :  { %9 = vsyncpa [#allocation5], 0  ;;  %s1363_s12 = smov 0   ;;  %s1365_s13 = smov 0  }
   0x2   :  { %s1367_s14 = smov 0  }
   0x3 LB: > { %s1071_s15 = sadd.s32 4294967295, %s1339_s14   ;;  %s27_s16 = sadd.s32 1, %s1335_s13  ;;  %s1339_s14 = sphi %s1367_s14, %s15_s14   ;;  %s1335_s13 = sphi %s1365_s13, %s1760_s13   ;;  %s1331_s12 = sphi %s1363_s12, %s1759_s12  }
   0x4   : > { %p29_p0 = scmp.ge.s32.totalorder %s27_s16, 2  ;;  %p1073_p1 = scmp.ge.s32.totalorder %s1339_s14, 1 }
   0x5   : > { %p130_p2 = scmp.lt.s32.totalorder %s1339_s14, 3  ;;  %p1382_p4 = scmp.eq.s32.totalorder %s1071_s15, 0 }
   0x6   : > { %s1762_s16 = smov (%p29_p0, %s27_s16), 0  ;;  %s142_s20 = sshll.u32 %s1754_s0, 4  ;;  %s143_s20 = int_to_ptr.vmem [resolvable:$true] %s142_s20 }
   0x7   : > { %p131_p3 = pnand %p1073_p1, %p130_p2  ;;  %s152_s23 = sshll.u32 %s1755_s1, 4  ;;  %s153_s23 = int_to_ptr.vmem [resolvable:$true] %s152_s23 }
   0x8   : > { %s1341_s24 = smov [#allocation2]   ;;  %s1342_s25 = smov [#allocation4]  }
   0x9   : > { %p1242_p5 = pneg %p131_p3 }
   0xa   : > { %178 = sbr.rel (%p131_p3) target bundleno = 154 (0x9a), region = 32 }
   0xb   : > { %p1243_p6 = pnand %p1382_p4, %p1242_p5 }
   0xd   : > { %1245 = dma.vmem_to_smem (!%p1243_p6), %s143_s20, 16, %s1341_s24, [#allocation3]  }
   0xe   : > { %1248 = dma.vmem_to_smem (!%p1243_p6), %s153_s23, 16, %s1342_s25, [#allocation5]  }
   0xf   : > { %1322 = dma.done.wait (%p1382_p4), [#allocation3], 16  }
  0x10   : > { %1324 = vsyncadd (%p1382_p4), [#allocation3], 4294967280 }
  0x11   : > { %1326 = dma.done.wait (%p1382_p4), [#allocation5], 16  }
  0x12   : > { %1328 = vsyncadd (%p1382_p4), [#allocation5], 4294967280 }
  0x13   : > { %190 = sfence }
  0x14   : > { %p218_p7 = scmp.lt.s32.totalorder %s1331_s12, 1  ;;  %s1404_s26 = sld [smem:[#allocation4 + $0x1]]  ;;  %vm946_vm0 = vcmask 1040384   ;;  %vm949_vm1 = vcmask 1041408   ;;  %vm952_vm2 = vcmask 1042432   ;;  %vm958_vm3 = vcmask 1043456  }
  0x15   : > { %s1406_s27 = sld [smem:[#allocation4 + $0x4]] }
  0x16   : > { %s1764_s12 = smov (!%p218_p7, %s1331_s12), 1  ;;  %s243_s28 = sld [smem:[#allocation2]] }
  0x17   : > { %s1232_s29 = sshll.u32 %s1764_s12, 3  ;;  %s1088_s30 = sld [smem:[#allocation2 + $0x1]] }
  0x18   : > { %s1090_s4 = sld [smem:[#allocation2 + $0x2]]  ;;  %s225_s8 = scalar_lea.vmem %s1756_s2, %s1232_s29 }
  0x19   : > { %s1092_s5 = sld [smem:[#allocation2 + $0x3]]  ;;  %v1414_v1 = vld [vmem:[%s225_s8] sm:$0xff] }
  0x1a   : > { %s1094_s9 = sld [smem:[#allocation2 + $0x4]]  ;;  %v1443_v33 = vstv %s1404_s26 }
  0x1b   : > { %s1095_s10 = sld [smem:[#allocation2 + $0x5]]  ;;  %v270_v34 = vstv %s1406_s27 }
  0x1c   : > { %v244_v0 = vstv %s243_s28  ;;  %s1097_s11 = sld [smem:[#allocation2 + $0x6]] }
  0x1d   : > { %v247_v2 = vstv %s1088_s30  ;;  %s1099_s15 = sld [smem:[#allocation2 + $0x7]]  ;;  %v245_v3 = vmul.f32 %v244_v0, %v1414_v1 }
  0x1e   : > { %v248_v4 = vmul.f32 %v247_v2, %v1414_v1  ;;  %v255_v5 = vstv %s1090_s4  ;;  %s1101_s17 = sld [smem:[#allocation2 + $0x8]] }
  0x1f   : > { %v256_v6 = vmul.f32 %v255_v5, %v1414_v1  ;;  %v263_v7 = vstv %s1092_s5  ;;  %s1102_s18 = sld [smem:[#allocation2 + $0x9]] }
  0x20   : > { %v1089_v8 = vrot.slane %v248_v4, 9  ;;  %v264_v9 = vmul.f32 %v263_v7, %v1414_v1  ;;  %v273_v10 = vstv %s1094_s9  ;;  %s1420_s19 = sld [smem:[#allocation2 + $0xa]] }
  0x21   : > { %v1091_v11 = vrot.slane %v256_v6, 10  ;;  %v274_v12 = vmul.f32 %v273_v10, %v1414_v1  ;;  %v276_v13 = vstv %s1095_s10  ;;  %s1423_s20 = sld [smem:[#allocation2 + $0xb]] }
  0x22   : > { %v253_v14 = vadd.f32 %v1089_v8, %v245_v3  ;;  %v1093_v15 = vrot.slane %v264_v9, 11  ;;  %v277_v16 = vmul.f32 %v276_v13, %v1414_v1  ;;  %v284_v17 = vstv %s1097_s11  ;;  %s1426_s21 = sld [smem:[#allocation2 + $0xc]] }
  0x23   : > { %v285_v18 = vmul.f32 %v284_v17, %v1414_v1  ;;  %v292_v19 = vstv %s1099_s15  ;;  %s1429_s22 = sld [smem:[#allocation2 + $0xd]] }
  0x24   : > { %v261_v20 = vadd.f32 %v1091_v11, %v253_v14  ;;  %v1096_v21 = vrot.slane %v277_v16, 9  ;;  %v293_v22 = vmul.f32 %v292_v19, %v1414_v1  ;;  %v301_v23 = vstv %s1101_s17  ;;  %s1432_s23 = sld [smem:[#allocation2 + $0xe]] }
  0x25   : > { %v1098_v24 = vrot.slane %v285_v18, 10  ;;  %v302_v25 = vmul.f32 %v301_v23, %v1414_v1  ;;  %v304_v26 = vstv %s1102_s18  ;;  %s1435_s24 = sld [smem:[#allocation2 + $0xf]] }
  0x26   : > { %s1437_s25 = sld [smem:[#allocation4 + $0x3]]  ;;  %v269_v27 = vadd.f32 %v1093_v15, %v261_v20  ;;  %v282_v28 = vadd.f32 %v1096_v21, %v274_v12  ;;  %v1100_v29 = vrot.slane %v293_v22, 11  ;;  %v305_v30 = vmul.f32 %v304_v26, %v1414_v1 }
  0x27   : > { %v312_v31 = vstv %s1420_s19  ;;  %v320_v32 = vstv %s1423_s20  ;;  %s1445_s28 = sld [smem:[#allocation4]] }
  0x28   : > { %v290_v35 = vadd.f32 %v1098_v24, %v282_v28  ;;  %v1103_v36 = vrot.slane %v305_v30, 9  ;;  %v313_v37 = vmul.f32 %v312_v31, %v1414_v1  ;;  %v271_v38 = vadd.f32 %v270_v34, %v269_v27  ;;  %s1452_s30 = sld [smem:[#allocation4 + $0x2]] }
  0x29   : > { %v321_v39 = vmul.f32 %v320_v32, %v1414_v1  ;;  %v329_v40 = vstv %s1426_s21  ;;  %v332_v41 = vstv %s1429_s22  ;;  %s1458_s26 = sld [smem:[#allocation2 + $0x10]] }
  0x2a   : > { %v298_v42 = vadd.f32 %v1100_v29, %v290_v35  ;;  %v310_v43 = vadd.f32 %v1103_v36, %v302_v25  ;;  %v1105_v44 = vrot.slane %v313_v37, 10  ;;  %v330_v45 = vmul.f32 %v329_v40, %v1414_v1  ;;  %s1462_s27 = sld [smem:[#allocation2 + $0x11]] }
  0x2b   : > { %v1107_v46 = vrot.slane %v321_v39, 11  ;;  %v333_v47 = vmul.f32 %v332_v41, %v1414_v1  ;;  %v340_v48 = vstv %s1432_s23  ;;  %v348_v49 = vstv %s1435_s24  ;;  %s1465_s4 = sld [smem:[#allocation2 + $0x12]] }
  0x2c   : > { %v299_v50 = vadd.f32 %v298_v42, %v270_v34  ;;  %v318_v51 = vadd.f32 %v1105_v44, %v310_v43  ;;  %v341_v52 = vmul.f32 %v340_v48, %v1414_v1  ;;  %v349_v53 = vmul.f32 %v348_v49, %v1414_v1  ;;  %s1469_s5 = sld [smem:[#allocation2 + $0x13]] }
  0x2d   : > { %v1110_v54 = vrot.slane %v333_v47, 9  ;;  %v357_v55 = vmul.f32 %v1443_v33, %v271_v38  ;;  %v365_v58 = vstv %s1437_s25  ;;  %s1472_s6 = sld [smem:[#allocation2 + $0x14]]  ;;  %v359_v0 = vstv %s1445_s28 }
  0x2e   : > { %v326_v56 = vadd.f32 %v1107_v46, %v318_v51  ;;  %v1112_v57 = vrot.slane %v341_v52, 10  ;;  %v368_v59 = vmul.f32 %v1443_v33, %v299_v50  ;;  %v1114_v61 = vrot.slane %v349_v53, 11  ;;  %s1475_s7 = sld [smem:[#allocation2 + $0x15]] }
  0x2f   : > { %v338_v60 = vadd.f32 %v1110_v54, %v330_v45  ;;  %v358_v62 = vsub.f32 %v1414_v1, %v357_v55  ;;  %v377_v5 = vmul.f32 %v365_v58, %v299_v50  ;;  %s1477_s8 = sld [smem:[#allocation2 + $0x16]]  ;;  %v366_v10 = vmul.f32 %v365_v58, %v271_v38 }
  0x30   : > { %v327_v63 = vadd.f32 %v326_v56, %v270_v34  ;;  %v370_v2 = vrot.slane %v368_v59, 7  ;;  %s1481_s9 = sld [smem:[#allocation2 + $0x17]]  ;;  %v363_v12 = vstv %s1452_s30  ;;  %v416_v18 = vstv %s1458_s26 }
  0x31   : > { %v346_v3 = vadd.f32 %v1112_v57, %v338_v60  ;;  %v360_v4 = vmul.f32 %v359_v0, %v358_v62  ;;  %s1483_s10 = sld [smem:[#allocation2 + $0x18]]  ;;  %v379_v17 = vrot.slane %v377_v5, 7  ;;  %v419_v21 = vstv %s1462_s27 }
  0x32   : > { %v372_v6 = vsub.f32 %v1414_v1, %v370_v2  ;;  %v382_v7 = vmul.f32 %v1443_v33, %v327_v63  ;;  %v391_v11 = vmul.f32 %v365_v58, %v327_v63  ;;  %s1486_s11 = sld [smem:[#allocation2 + $0x19]]  ;;  %v427_v22 = vstv %s1465_s4 }
  0x33   : > { %v354_v8 = vadd.f32 %v1114_v61, %v346_v3  ;;  %v1115_v9 = vclamps-f32 %v360_v4, 1.0  ;;  %s1489_s15 = sld [smem:[#allocation2 + $0x1a]]  ;;  %v435_v29 = vstv %s1469_s5  ;;  %v445_v30 = vstv %s1472_s6 }
  0x34   : > { %v373_v13 = vmul.f32 %v372_v6, %v359_v0  ;;  %v384_v14 = vrot.slane %v382_v7, 6  ;;  %s1494_s17 = sld [smem:[#allocation2 + $0x1b]]  ;;  %v393_v24 = vrot.slane %v391_v11, 6  ;;  %v448_v32 = vstv %s1475_s7 }
  0x35   : > { %v355_v15 = vadd.f32 %v354_v8, %v270_v34  ;;  %v364_v16 = vmul.f32 %v1115_v9, %v363_v12  ;;  %s1499_s18 = sld [smem:[#allocation2 + $0x1c]]  ;;  %v456_v34 = vstv %s1477_s8 }
  0x36   : > { %v1116_v19 = vclamps-f32 %v373_v13, 1.0  ;;  %v386_v20 = vsub.f32 %v1414_v1, %v384_v14  ;;  %s1503_s19 = sld [smem:[#allocation2 + $0x1d]]  ;;  %v464_v35 = vstv %s1481_s9 }
  0x37   : > { %v1496_v23 = vadd.f32 %v366_v10, %v364_v16  ;;  %v396_v25 = vmul.f32 %v1443_v33, %v355_v15  ;;  %v405_v26 = vmul.f32 %v365_v58, %v355_v15  ;;  %s1508_s20 = sld [smem:[#allocation2 + $0x1e]]  ;;  %v473_v37 = vstv %s1483_s10 }
  0x38   : > { %v376_v27 = vmul.f32 %v1116_v19, %v363_v12  ;;  %v387_v28 = vmul.f32 %v386_v20, %v359_v0  ;;  %v476_v38 = vstv %s1486_s11  ;;  %s1517_s21 = sld [smem:[#allocation2 + $0x1f]] }
  0x39   : > { %v398_v31 = vrot.slane %v396_v25, 5  ;;  %v407_v40 = vrot.slane %v405_v26, 5  ;;  %v417_v41 = vmul.f32 %v416_v18, %v1496_v23  ;;  %v446_v42 = vmul.f32 %v445_v30, %v1496_v23  ;;  %s1522_s22 = sld [smem:[#allocation4 + $0x5]] }
  0x3a   : > { %v1510_v36 = vadd.f32 %v379_v17, %v376_v27  ;;  %v1117_v33 = vclamps-f32 %v387_v28, 1.0  ;;  %v484_v48 = vstv %s1489_s15  ;;  %v492_v49 = vstv %s1494_s17  ;;  %s1529_s23 = sld [smem:[#allocation4 + $0x6]] }
  0x3b   : > { %v400_v39 = vsub.f32 %v1414_v1, %v398_v31  ;;  %v474_v1 = vmul.f32 %v473_v37, %v1496_v23  ;;  %s1531_s24 = sld [smem:[#allocation4 + $0x7]]  ;;  %v501_v55 = vstv %s1499_s18 }
  0x3c   : > { %v390_v43 = vmul.f32 %v1117_v33, %v363_v12  ;;  %v420_v44 = vmul.f32 %v419_v21, %v1510_v36  ;;  %v449_v45 = vmul.f32 %v448_v32, %v1510_v36  ;;  %v477_v46 = vmul.f32 %v476_v38, %v1510_v36  ;;  %s1536_s25 = sld [smem:[#allocation4 + $0x9]] }
  0x3d   : > { %v401_v47 = vmul.f32 %v400_v39, %v359_v0  ;;  %v504_v56 = vstv %s1503_s19  ;;  %v512_v57 = vstv %s1508_s20  ;;  %s1540_s28 = sld [smem:[#allocation4 + $0x8]]  ;;  %v502_v5 = vmul.f32 %v501_v55, %v1496_v23 }
  0x3e   : > { %v1527_v50 = vadd.f32 %v393_v24, %v390_v43  ;;  %v1126_v51 = vrot.slane %v420_v44, 9  ;;  %v1133_v52 = vrot.slane %v449_v45, 9  ;;  %v1140_v53 = vrot.slane %v477_v46, 9  ;;  %s1546_s30 = sld [smem:[#allocation2 + $0x20]] }
  0x3f   : > { %v1118_v54 = vclamps-f32 %v401_v47, 1.0  ;;  %v505_v2 = vmul.f32 %v504_v56, %v1510_v36  ;;  %v520_v10 = vstv %s1517_s21  ;;  %s1551_s26 = sld [smem:[#allocation2 + $0x21]]  ;;  %v531_v39 = vstv %s1522_s22 }
  0x40   : > { %v425_v58 = vadd.f32 %v1126_v51, %v417_v41  ;;  %v428_v59 = vmul.f32 %v427_v22, %v1527_v50  ;;  %v454_v60 = vadd.f32 %v1133_v52, %v446_v42  ;;  %v457_v61 = vmul.f32 %v456_v34, %v1527_v50  ;;  %s1553_s27 = sld [smem:[#allocation2 + $0x22]] }
  0x41   : > { %v404_v62 = vmul.f32 %v1118_v54, %v363_v12  ;;  %v482_v63 = vadd.f32 %v1140_v53, %v474_v1  ;;  %v485_v0 = vmul.f32 %v484_v48, %v1527_v50  ;;  %v513_v6 = vmul.f32 %v512_v57, %v1527_v50  ;;  %s1558_s4 = sld [smem:[#allocation2 + $0x23]] }
  0x42   : > { %v1128_v3 = vrot.slane %v428_v59, 10  ;;  %v1135_v4 = vrot.slane %v457_v61, 10  ;;  %v1147_v9 = vrot.slane %v505_v2, 9  ;;  %s1561_s5 = sld [smem:[#allocation2 + $0x24]]  ;;  %v442_v24 = vstv %s1536_s25 }
  0x43   : > { %v1548_v7 = vadd.f32 %v407_v40, %v404_v62  ;;  %v1142_v8 = vrot.slane %v485_v0, 10  ;;  %v1149_v13 = vrot.slane %v513_v6, 10  ;;  %s1563_s6 = sld [smem:[#allocation2 + $0x25]]  ;;  %v528_v31 = vstv %s1529_s23 }
  0x44   : > { %v433_v11 = vadd.f32 %v1128_v3, %v425_v58  ;;  %v462_v12 = vadd.f32 %v1135_v4, %v454_v60  ;;  %v510_v18 = vadd.f32 %v1147_v9, %v502_v5  ;;  %s1566_s7 = sld [smem:[#allocation2 + $0x26]]  ;;  %v537_v37 = vstv %s1540_s28 }
  0x45   : > { %v436_v14 = vmul.f32 %v435_v29, %v1548_v7  ;;  %v465_v15 = vmul.f32 %v464_v35, %v1548_v7  ;;  %v490_v16 = vadd.f32 %v1142_v8, %v482_v63  ;;  %v493_v17 = vmul.f32 %v492_v49, %v1548_v7  ;;  %s1568_s8 = sld [smem:[#allocation2 + $0x27]] }
  0x46   : > { %v521_v19 = vmul.f32 %v520_v10, %v1548_v7  ;;  %v518_v25 = vadd.f32 %v1149_v13, %v510_v18  ;;  %s1571_s9 = sld [smem:[#allocation2 + $0x28]]  ;;  %v535_v40 = vstv %s1531_s24  ;;  %v588_v44 = vstv %s1546_s30 }
  0x47   : > { %v1130_v20 = vrot.slane %v436_v14, 11  ;;  %v1137_v21 = vrot.slane %v465_v15, 11  ;;  %v1144_v22 = vrot.slane %v493_v17, 11  ;;  %s1573_s10 = sld [smem:[#allocation2 + $0x29]]  ;;  %v591_v45 = vstv %s1551_s26 }
  0x48   : > { %v1151_v26 = vrot.slane %v521_v19, 11  ;;  %s1576_s11 = sld [smem:[#allocation2 + $0x2a]]  ;;  %v599_v48 = vstv %s1553_s27  ;;  %v607_v53 = vstv %s1558_s4  ;;  %v617_v57 = vstv %s1561_s5 }
  0x49   : > { %v441_v27 = vadd.f32 %v1130_v20, %v433_v11  ;;  %v470_v28 = vadd.f32 %v1137_v21, %v462_v12  ;;  %v498_v29 = vadd.f32 %v1144_v22, %v490_v16  ;;  %s1580_s15 = sld [smem:[#allocation2 + $0x2b]]  ;;  %v620_v59 = vstv %s1563_s6 }
  0x4a   : > { %v526_v30 = vadd.f32 %v1151_v26, %v518_v25  ;;  %s1584_s17 = sld [smem:[#allocation2 + $0x2c]]  ;;  %v628_v60 = vstv %s1566_s7 }
  0x4b   : > { %v443_v32 = vadd.f32 %v442_v24, %v441_v27  ;;  %v471_v34 = vadd.f32 %v470_v28, %v442_v24  ;;  %v499_v35 = vadd.f32 %v498_v29, %v442_v24  ;;  %s1588_s18 = sld [smem:[#allocation2 + $0x2d]]  ;;  %v636_v4 = vstv %s1568_s8 }
  0x4c   : > { %v527_v33 = vadd.f32 %v526_v30, %v442_v24  ;;  %s1591_s19 = sld [smem:[#allocation2 + $0x2e]] }
  0x4d   : > { %v529_v38 = vmul.f32 %v528_v31, %v443_v32  ;;  %v540_v41 = vmul.f32 %v528_v31, %v471_v34  ;;  %v554_v42 = vmul.f32 %v528_v31, %v499_v35  ;;  %v549_v1 = vmul.f32 %v537_v37, %v471_v34  ;;  %s1595_s20 = sld [smem:[#allocation2 + $0x2f]] }
  0x4e   : > { %v568_v43 = vmul.f32 %v528_v31, %v527_v33  ;;  %v563_v51 = vmul.f32 %v537_v37, %v499_v35  ;;  %v577_v56 = vmul.f32 %v537_v37, %v527_v33  ;;  %v538_v62 = vmul.f32 %v537_v37, %v443_v32  ;;  %s1607_s21 = sld [smem:[#allocation4 + $0xa]] }
  0x4f   : > { %v530_v46 = vsub.f32 %v1496_v23, %v529_v38  ;;  %v542_v47 = vrot.slane %v540_v41, 7  ;;  %v556_v49 = vrot.slane %v554_v42, 6  ;;  %v551_v0 = vrot.slane %v549_v1, 7  ;;  %s1611_s22 = sld [smem:[#allocation4 + $0xb]] }
  0x50   : > { %v570_v52 = vrot.slane %v568_v43, 5  ;;  %v648_v10 = vstv %s1573_s10  ;;  %v656_v11 = vstv %s1576_s11  ;;  %v664_v14 = vstv %s1580_s15  ;;  %s1617_s23 = sld [smem:[#allocation4 + $0xe]] }
  0x51   : > { %v532_v54 = vmul.f32 %v531_v39, %v530_v46  ;;  %v544_v55 = vsub.f32 %v1510_v36, %v542_v47  ;;  %v558_v23 = vsub.f32 %v1527_v50, %v556_v49  ;;  %v565_v36 = vrot.slane %v563_v51, 6  ;;  %s1626_s24 = sld [smem:[#allocation4 + $0xc]] }
  0x52   : > { %v572_v58 = vsub.f32 %v1548_v7, %v570_v52  ;;  %v579_v50 = vrot.slane %v577_v56, 5  ;;  %v645_v7 = vstv %s1571_s9  ;;  %v673_v15 = vstv %s1584_s17  ;;  %s1630_s25 = sld [smem:[#allocation4 + $0xd]] }
  0x53   : > { %v1152_v61 = vclamps-f32 %v532_v54, 1.0  ;;  %v545_v63 = vmul.f32 %v544_v55, %v531_v39  ;;  %v559_v2 = vmul.f32 %v558_v23, %v531_v39  ;;  %v676_v18 = vstv %s1588_s18  ;;  %s1640_s28 = sld [smem:[#allocation2 + $0x30]] }
  0x54   : > { %v573_v3 = vmul.f32 %v572_v58, %v531_v39  ;;  %v684_v19 = vstv %s1591_s19  ;;  %v692_v24 = vstv %s1595_s20  ;;  %s1643_s30 = sld [smem:[#allocation2 + $0x31]] }
  0x55   : > { %v536_v5 = vmul.f32 %v1152_v61, %v535_v40  ;;  %v1153_v6 = vclamps-f32 %v545_v63, 1.0  ;;  %v1154_v8 = vclamps-f32 %v559_v2, 1.0  ;;  %s1645_s26 = sld [smem:[#allocation2 + $0x32]]  ;;  %v700_v2 = vstv %s1611_s22 }
  0x56   : > { %v1155_v9 = vclamps-f32 %v573_v3, 1.0  ;;  %s1647_s27 = sld [smem:[#allocation2 + $0x33]]  ;;  %v614_v55 = vstv %s1617_s23 }
  0x57   : > { %v1605_v12 = vadd.f32 %v538_v62, %v536_v5  ;;  %v548_v13 = vmul.f32 %v1153_v6, %v535_v40  ;;  %v562_v16 = vmul.f32 %v1154_v8, %v535_v40  ;;  %s1652_s4 = sld [smem:[#allocation2 + $0x34]]  ;;  %v703_v6 = vstv %s1607_s21 }
  0x58   : > { %v576_v17 = vmul.f32 %v1155_v9, %v535_v40  ;;  %s1655_s5 = sld [smem:[#allocation2 + $0x35]]  ;;  %v709_v8 = vstv %s1630_s25 }
  0x59   : > { %v1615_v20 = vadd.f32 %v551_v0, %v548_v13  ;;  %v589_v21 = vmul.f32 %v588_v44, %v1605_v12  ;;  %v618_v22 = vmul.f32 %v617_v57, %v1605_v12  ;;  %v1622_v25 = vadd.f32 %v565_v36, %v562_v16  ;;  %s1657_s6 = sld [smem:[#allocation2 + $0x36]] }
  0x5a   : > { %v1624_v26 = vadd.f32 %v579_v50, %v576_v17  ;;  %v646_v27 = vmul.f32 %v645_v7, %v1605_v12  ;;  %v674_v28 = vmul.f32 %v673_v15, %v1605_v12  ;;  %s1659_s7 = sld [smem:[#allocation2 + $0x37]]  ;;  %v707_v7 = vstv %s1626_s24 }
  0x5b   : > { %v592_v29 = vmul.f32 %v591_v45, %v1615_v20  ;;  %v621_v30 = vmul.f32 %v620_v59, %v1615_v20  ;;  %v649_v31 = vmul.f32 %v648_v10, %v1615_v20  ;;  %v677_v32 = vmul.f32 %v676_v18, %v1615_v20  ;;  %s1662_s8 = sld [smem:[#allocation2 + $0x38]] }
  0x5c   : > { %v600_v34 = vmul.f32 %v599_v48, %v1622_v25  ;;  %v608_v35 = vmul.f32 %v607_v53, %v1624_v26  ;;  %v629_v33 = vmul.f32 %v628_v60, %v1622_v25  ;;  %v637_v37 = vmul.f32 %v636_v4, %v1624_v26  ;;  %s1664_s9 = sld [smem:[#allocation2 + $0x39]] }
  0x5d   : > { %v1163_v38 = vrot.slane %v592_v29, 9  ;;  %v1170_v39 = vrot.slane %v621_v30, 9  ;;  %v1177_v40 = vrot.slane %v649_v31, 9  ;;  %v657_v41 = vmul.f32 %v656_v11, %v1622_v25  ;;  %s1667_s10 = sld [smem:[#allocation2 + $0x3a]] }
  0x5e   : > { %v1165_v42 = vrot.slane %v600_v34, 10  ;;  %v1167_v43 = vrot.slane %v608_v35, 11  ;;  %v1172_v44 = vrot.slane %v629_v33, 10  ;;  %v1174_v45 = vrot.slane %v637_v37, 11  ;;  %s1671_s11 = sld [smem:[#allocation2 + $0x3b]] }
  0x5f   : > { %v597_v46 = vadd.f32 %v1163_v38, %v589_v21  ;;  %v626_v47 = vadd.f32 %v1170_v39, %v618_v22  ;;  %v654_v1 = vadd.f32 %v1177_v40, %v646_v27  ;;  %v1179_v48 = vrot.slane %v657_v41, 10  ;;  %s1675_s15 = sld [smem:[#allocation2 + $0x3c]] }
  0x60   : > { %v665_v49 = vmul.f32 %v664_v14, %v1624_v26  ;;  %v1184_v51 = vrot.slane %v677_v32, 9  ;;  %v685_v52 = vmul.f32 %v684_v19, %v1622_v25  ;;  %v693_v53 = vmul.f32 %v692_v24, %v1624_v26  ;;  %s1680_s17 = sld [smem:[#allocation2 + $0x3d]] }
  0x61   : > { %v605_v54 = vadd.f32 %v1165_v42, %v597_v46  ;;  %v634_v56 = vadd.f32 %v1172_v44, %v626_v47  ;;  %v662_v57 = vadd.f32 %v1179_v48, %v654_v1  ;;  %v760_v13 = vstv %s1640_s28  ;;  %s1683_s18 = sld [smem:[#allocation2 + $0x3e]] }
  0x62   : > { %v1181_v23 = vrot.slane %v665_v49, 11  ;;  %v682_v58 = vadd.f32 %v1184_v51, %v674_v28  ;;  %v1186_v59 = vrot.slane %v685_v52, 10  ;;  %v1188_v60 = vrot.slane %v693_v53, 11  ;;  %s1687_s19 = sld [smem:[#allocation2 + $0x3f]] }
  0x63   : > { %v613_v61 = vadd.f32 %v1167_v43, %v605_v54  ;;  %v642_v62 = vadd.f32 %v1174_v45, %v634_v56  ;;  %v763_v14 = vstv %s1643_s30  ;;  %v771_v17 = vstv %s1645_s26  ;;  %s1709_s20 = sld [smem:[#allocation4 + $0x13]]  ;;  %s235_s30 = scalar_lea.vmem %s1757_s3, %s1232_s29 }
  0x64   : > { %v670_v63 = vadd.f32 %v1181_v23, %v662_v57  ;;  %v690_v0 = vadd.f32 %v1186_v59, %v682_v58  ;;  %v779_v18 = vstv %s1647_s27  ;;  %v789_v24 = vstv %s1652_s4  ;;  %s1719_s21 = sld [smem:[#allocation4 + $0x10]] }
  0x65   : > { %v615_v36 = vadd.f32 %v614_v55, %v613_v61  ;;  %v643_v3 = vadd.f32 %v642_v62, %v614_v55  ;;  %v792_v30 = vstv %s1655_s5  ;;  %v800_v32 = vstv %s1657_s6  ;;  %s1728_s22 = sld [smem:[#allocation4 + $0xf]] }
  0x66   : > { %v671_v4 = vadd.f32 %v670_v63, %v614_v55  ;;  %v698_v5 = vadd.f32 %v1188_v60, %v690_v0  ;;  %v808_v34 = vstv %s1659_s7  ;;  %v817_v41 = vstv %s1662_s8  ;;  %s1196_s23 = sld [smem:[#allocation4 + $0x12]] }
  0x67   : > { %v701_v50 = vmul.f32 %v700_v2, %v615_v36  ;;  %v712_v9 = vmul.f32 %v700_v2, %v643_v3  ;;  %v721_v19 = vmul.f32 %v709_v8, %v643_v3  ;;  %v710_v33 = vmul.f32 %v709_v8, %v615_v36  ;;  %s1195_s24 = sld [smem:[#allocation4 + $0x11]] }
  0x68   : > { %v699_v10 = vadd.f32 %v698_v5, %v614_v55  ;;  %v726_v11 = vmul.f32 %v700_v2, %v671_v4  ;;  %v735_v29 = vmul.f32 %v709_v8, %v671_v4  ;;  %v820_v44 = vstv %s1664_s9 }
  0x69   : > { %v702_v15 = vsub.f32 %v1605_v12, %v701_v50  ;;  %v714_v16 = vrot.slane %v712_v9, 7  ;;  %v723_v39 = vrot.slane %v721_v19, 7  ;;  %v828_v47 = vstv %s1667_s10 }
  0x6a   : > { %v728_v21 = vrot.slane %v726_v11, 6  ;;  %v740_v22 = vmul.f32 %v700_v2, %v699_v10  ;;  %v749_v38 = vmul.f32 %v709_v8, %v699_v10  ;;  %v836_v1 = vstv %s1671_s11 }
  0x6b   : > { %v704_v27 = vmul.f32 %v703_v6, %v702_v15  ;;  %v716_v28 = vsub.f32 %v1615_v20, %v714_v16  ;;  %v845_v52 = vstv %s1675_s15  ;;  %v856_v55 = vstv %s1683_s18 }
  0x6c   : > { %v730_v12 = vsub.f32 %v1622_v25, %v728_v21  ;;  %v742_v31 = vrot.slane %v740_v22, 5  ;;  %v737_v25 = vrot.slane %v735_v29, 6  ;;  %v751_v51 = vrot.slane %v749_v38, 5 }
  0x6d   : > { %v1189_v35 = vclamps-f32 %v704_v27, 1.0  ;;  %v717_v37 = vmul.f32 %v716_v28, %v703_v6  ;;  %v864_v58 = vstv %s1687_s19 }
  0x6e   : > { %v731_v40 = vmul.f32 %v730_v12, %v703_v6  ;;  %v744_v20 = vsub.f32 %v1624_v26, %v742_v31  ;;  %v848_v26 = vstv %s1680_s17  ;;  %v786_v12 = vstv %s1709_s20 }
  0x6f   : > { %v708_v42 = vmul.f32 %v1189_v35, %v707_v7  ;;  %v1190_v43 = vclamps-f32 %v717_v37, 1.0 }
  0x70   : > { %v1191_v45 = vclamps-f32 %v731_v40, 1.0  ;;  %v745_v46 = vmul.f32 %v744_v20, %v703_v6 }
  0x71   : > { %v1697_v48 = vadd.f32 %v710_v33, %v708_v42  ;;  %v720_v49 = vmul.f32 %v1190_v43, %v707_v7 }
  0x72   : > { %v734_v53 = vmul.f32 %v1191_v45, %v707_v7  ;;  %v1192_v54 = vclamps-f32 %v745_v46, 1.0  ;;  %v875_v45 = vstv %s1728_s22  ;;  %v881_v46 = vstv %s1196_s23 }
  0x73   : > { %v1702_v56 = vadd.f32 %v723_v39, %v720_v49  ;;  %v761_v57 = vmul.f32 %v760_v13, %v1697_v48  ;;  %v790_v23 = vmul.f32 %v789_v24, %v1697_v48  ;;  %v818_v61 = vmul.f32 %v817_v41, %v1697_v48 }
  0x74   : > { %v1707_v59 = vadd.f32 %v737_v25, %v734_v53  ;;  %v748_v60 = vmul.f32 %v1192_v54, %v707_v7  ;;  %v846_v62 = vmul.f32 %v845_v52, %v1697_v48  ;;  %v872_v39 = vstv %s1719_s21 }
  0x75   : > { %v764_v63 = vmul.f32 %v763_v14, %v1702_v56  ;;  %v793_v0 = vmul.f32 %v792_v30, %v1702_v56  ;;  %v821_v2 = vmul.f32 %v820_v44, %v1702_v56  ;;  %v849_v36 = vmul.f32 %v848_v26, %v1702_v56 }
  0x76   : > { %v1717_v3 = vadd.f32 %v751_v51, %v748_v60  ;;  %v772_v4 = vmul.f32 %v771_v17, %v1707_v59  ;;  %v801_v5 = vmul.f32 %v800_v32, %v1707_v59  ;;  %v829_v6 = vmul.f32 %v828_v47, %v1707_v59 }
  0x77   : > { %v1200_v50 = vrot.slane %v764_v63, 9  ;;  %v1207_v7 = vrot.slane %v793_v0, 9  ;;  %v1214_v8 = vrot.slane %v821_v2, 9  ;;  %v1221_v9 = vrot.slane %v849_v36, 9 }
  0x78   : > { %v1202_v10 = vrot.slane %v772_v4, 10  ;;  %v780_v11 = vmul.f32 %v779_v18, %v1717_v3  ;;  %v1209_v13 = vrot.slane %v801_v5, 10  ;;  %v809_v14 = vmul.f32 %v808_v34, %v1717_v3 }
  0x79   : > { %v769_v15 = vadd.f32 %v1200_v50, %v761_v57  ;;  %v798_v16 = vadd.f32 %v1207_v7, %v790_v23  ;;  %v826_v17 = vadd.f32 %v1214_v8, %v818_v61  ;;  %v1216_v19 = vrot.slane %v829_v6, 10 }
  0x7a   : > { %v1204_v21 = vrot.slane %v780_v11, 11  ;;  %v1211_v22 = vrot.slane %v809_v14, 11  ;;  %v837_v24 = vmul.f32 %v836_v1, %v1717_v3  ;;  %v854_v27 = vadd.f32 %v1221_v9, %v846_v62 }
  0x7b   : > { %v777_v28 = vadd.f32 %v1202_v10, %v769_v15  ;;  %v806_v29 = vadd.f32 %v1209_v13, %v798_v16  ;;  %v834_v18 = vadd.f32 %v1216_v19, %v826_v17  ;;  %v857_v30 = vmul.f32 %v856_v55, %v1707_v59 }
  0x7c   : > { %v1218_v31 = vrot.slane %v837_v24, 11  ;;  %v865_v32 = vmul.f32 %v864_v58, %v1717_v3  ;;  %v879_v57 = vstv %s1195_s24 }
  0x7d   : > { %v785_v34 = vadd.f32 %v1204_v21, %v777_v28  ;;  %v814_v35 = vadd.f32 %v1211_v22, %v806_v29  ;;  %v1223_v33 = vrot.slane %v857_v30, 10 }
  0x7e   : > { %v842_v37 = vadd.f32 %v1218_v31, %v834_v18  ;;  %v1225_v38 = vrot.slane %v865_v32, 11 }
  0x7f   : > { %v787_v40 = vadd.f32 %v786_v12, %v785_v34  ;;  %v815_v20 = vadd.f32 %v814_v35, %v786_v12  ;;  %v862_v41 = vadd.f32 %v1223_v33, %v854_v27 }
  0x80   : > { %v843_v42 = vadd.f32 %v842_v37, %v786_v12 }
  0x81   : > { %v870_v43 = vadd.f32 %v1225_v38, %v862_v41  ;;  %v873_v25 = vmul.f32 %v872_v39, %v787_v40  ;;  %v884_v44 = vmul.f32 %v872_v39, %v815_v20  ;;  %v893_v26 = vmul.f32 %v881_v46, %v815_v20 }
  0x82   : > { %v898_v47 = vmul.f32 %v872_v39, %v843_v42  ;;  %v907_v58 = vmul.f32 %v881_v46, %v843_v42  ;;  %v882_v61 = vmul.f32 %v881_v46, %v787_v40 }
  0x83   : > { %v871_v1 = vadd.f32 %v870_v43, %v786_v12  ;;  %v874_v49 = vsub.f32 %v1697_v48, %v873_v25  ;;  %v886_v51 = vrot.slane %v884_v44, 7  ;;  %v895_v48 = vrot.slane %v893_v26, 7 }
  0x84   : > { %v900_v52 = vrot.slane %v898_v47, 6  ;;  %v909_v50 = vrot.slane %v907_v58, 6 }
  0x85   : > { %v876_v53 = vmul.f32 %v875_v45, %v874_v49  ;;  %v888_v54 = vsub.f32 %v1702_v56, %v886_v51  ;;  %v912_v55 = vmul.f32 %v872_v39, %v871_v1  ;;  %v921_v2 = vmul.f32 %v881_v46, %v871_v1 }
  0x86   : > { %v902_v23 = vsub.f32 %v1707_v59, %v900_v52 }
  0x87   : > { %v1226_v60 = vclamps-f32 %v876_v53, 1.0  ;;  %v889_v62 = vmul.f32 %v888_v54, %v875_v45  ;;  %v914_v63 = vrot.slane %v912_v55, 5  ;;  %v923_v10 = vrot.slane %v921_v2, 5 }
  0x88   : > { %v903_v0 = vmul.f32 %v902_v23, %v875_v45 }
  0x89   : > { %v880_v36 = vmul.f32 %v1226_v60, %v879_v57  ;;  %v1227_v4 = vclamps-f32 %v889_v62, 1.0  ;;  %v916_v5 = vsub.f32 %v1717_v3, %v914_v63 }
  0x8a   : > { %v1228_v6 = vclamps-f32 %v903_v0, 1.0 }
  0x8b   : > { %v883_v56 = vadd.f32 %v882_v61, %v880_v36  ;;  %v892_v7 = vmul.f32 %v1227_v4, %v879_v57  ;;  %v917_v8 = vmul.f32 %v916_v5, %v875_v45 }
  0x8c   : > { %v906_v9 = vmul.f32 %v1228_v6, %v879_v57 }
  0x8d   : > { %v897_v59 = vadd.f32 %v895_v48, %v892_v7  ;;  %v1229_v11 = vclamps-f32 %v917_v8, 1.0  ;;  %v927_v13 = vperm.slane %v883_v56, 0  ;;  %v928_v14 = vperm.slane %v883_v56, 4 }
  0x8e   : > { %v911_v15 = vadd.f32 %v909_v50, %v906_v9 }
  0x8f   : > { %v920_v16 = vmul.f32 %v1229_v11, %v879_v57  ;;  %v932_v17 = vperm.slane %v897_v59, 1  ;;  %v933_v19 = vperm.slane %v897_v59, 5 }
  0x90   : > { %v937_v21 = vperm.slane %v911_v15, 2  ;;  %v938_v3 = vperm.slane %v911_v15, 6 }
  0x91   : > { %v925_v22 = vadd.f32 %v923_v10, %v920_v16  ;;  %v947_v24 = vsel %vm946_vm0, %v927_v13, %v932_v17  ;;  %v948_v27 = vsel %vm946_vm0, %v928_v14, %v933_v19 }
  0x92   : > { %v950_v28 = vsel %vm949_vm1, %v947_v24, %v937_v21  ;;  %v951_v29 = vsel %vm949_vm1, %v948_v27, %v938_v3 }
  0x93   : > { %v942_v18 = vperm.slane %v925_v22, 3  ;;  %v943_v30 = vperm.slane %v925_v22, 7 }
  0x95   : > { %v953_v12 = vsel %vm952_vm2, %v950_v28, %v942_v18  ;;  %v954_v31 = vsel %vm952_vm2, %v951_v29, %v943_v30 }
  0x96   : > { %v957_v32 = vrot.slane %v954_v31, 4 }
  0x98   : > { %v959_v34 = vsel %vm958_vm3, %v953_v12, %v957_v32 }
  0x99   : > { %961 = vst [vmem:[%s235_s30] sm:$0xff] %v959_v34 }
  0x9a PF: > { %s15_s14 = sadd.s32 1, %s1339_s14   ;;  %s1759_s12 = smov %s1335_s13 }
  0x9b   : > { %p12_p8 = scmp.ge.s32.totalorder %s15_s14, 4   ;;  %s1760_s13 = smov %s1762_s16 }
  0x9d   :  { %14 = sbr.rel (!%p12_p8) target bundleno = 3 (0x3), region = 71 }
  0xa2   :  { %992 = vsyncpa [#allocation3], 1 }
  0xa3   :  { %994 = vsyncpa [#allocation3 + $0x1], 1 }
  0xa4   :  { %995 = vsyncpa [#allocation5], 1 }

</bundles_post_ra>
